<compile_context>
chip_gen: v6e
topology: v6e:2x2x1
jax: 0.10.0
libtpu: 0.0.40
codegen_flags: <defaults>
</compile_context>

<pallas_src>
import functools

import jax
import jax.numpy as jnp
from jax.experimental import pallas as pl
from jax.experimental.pallas import tpu as pltpu

BN_EPS = 1e-5


def _stack_rows(a, b):
    """Stack two (1, X) rows into (2, X) without relying on concatenate lowering."""
    shape = (2,) + a.shape[1:]
    rows = jax.lax.broadcasted_iota(jnp.int32, shape, 0)
    return jnp.where(rows == 0, jnp.broadcast_to(a, shape), jnp.broadcast_to(b, shape))


# ----------------------------------------------------------------------------
# Fused kernel: conv1 + BN1 + ReLU  ->  conv2 + BN2 (residual)  ->  upsample.
# Lane dim = fused (w, c):
#   x_ref      : (N, H+2, W*Cin)   bf16, H pre-padded with zero halo rows
#   wb1_ref    : (3, W*Cin, W*C2)  bf16, per-kh banded conv1 weights
#   wb2_ref    : (3, W*C2, W*C2)   bf16, per-kh banded conv2 weights
#   wbu_ref    : (W*C2, W*4*Cout)  bf16, block-diag ConvTranspose2d weight
#   bu_ref     : (1, W*4*Cout)     f32, bias tiled per (w, kh, kw, co)
#   expand_ref : (W*C2, C2)        f32, 0/1 per-channel collapse
#   spread_ref : (C2, W*C2)        f32, 0/1 per-channel broadcast
#   res_ref    : (N*H, W*C2)       f32 residual output (128 lanes, aligned)
#   up_ref     : (N*H, W*4*Cout)   f32 upsample output (256 lanes, aligned)
#   o1pad_ref  : (N, H+2, W*C2)    bf16 scratch, H-padded conv2 input
# ----------------------------------------------------------------------------
def _fused_kernel(x_ref, wb1_ref, wb2_ref, wbu_ref, bu_ref, expand_ref, spread_ref,
                  res_ref, up_ref, o1pad_ref, *, N, H, W, Cin, C2):
    f32 = jnp.float32
    bf16 = jnp.bfloat16
    NH = N * H
    WCin = W * Cin
    WC2 = W * C2
    inv_cnt = 1.0 / float(N * H * W)

    expand = expand_ref[...]                     # (W*C2, C2)
    spread = spread_ref[...]                     # (C2, W*C2)

    def batchnorm(acc):                          # acc: (NH, WC2) f32
        s = jnp.sum(acc, axis=0, keepdims=True)              # (1, WC2)
        q = jnp.sum(acc * acc, axis=0, keepdims=True)        # (1, WC2)
        sq = _stack_rows(s, q)                               # (2, WC2)
        sq_c = jnp.dot(sq, expand, preferred_element_type=f32)   # (2, C2)
        mean = sq_c[0:1, :] * inv_cnt
        ex2 = sq_c[1:2, :] * inv_cnt
        # one-pass variance can go slightly negative from cancellation -> clamp
        var = jnp.maximum(ex2 - mean * mean, 0.0)
        scale = jax.lax.rsqrt(var + BN_EPS)
        shift = -mean * scale
        ss = _stack_rows(scale, shift)                        # (2, C2)
        ss_f = jnp.dot(ss, spread, preferred_element_type=f32)    # (2, WC2)
        return acc * ss_f[0:1, :] + ss_f[1:2, :]

    # ---- conv1: three accumulating matmuls over H-shifted views ------------
    x_top = x_ref[:, 0:H, :].reshape(NH, WCin)        # input row h-1 (kh=0)
    x_mid = x_ref[:, 1:H + 1, :].reshape(NH, WCin)    # input row h   (kh=1)
    x_bot = x_ref[:, 2:H + 2, :].reshape(NH, WCin)    # input row h+1 (kh=2)
    acc1 = (jnp.dot(x_top, wb1_ref[0], preferred_element_type=f32)
            + jnp.dot(x_mid, wb1_ref[1], preferred_element_type=f32)
            + jnp.dot(x_bot, wb1_ref[2], preferred_element_type=f32))
    out1 = jnp.maximum(batchnorm(acc1), 0.0).astype(bf16)      # (NH, WC2)

    # ---- conv2: lane-aligned single store into an H-padded scratch ----------
    o1pad_ref[:, 0:1, :] = jnp.zeros((N, 1, WC2), bf16)        # halo row only
    o1pad_ref[:, H + 1:H + 2, :] = jnp.zeros((N, 1, WC2), bf16)
    o1pad_ref[:, 1:H + 1, :] = out1.reshape(N, H, WC2)

    o_top = o1pad_ref[:, 0:H, :].reshape(NH, WC2)              # row h-1
    o_bot = o1pad_ref[:, 2:H + 2, :].reshape(NH, WC2)          # row h+1
    acc2 = (jnp.dot(o_top, wb2_ref[0], preferred_element_type=f32)
            + jnp.dot(out1, wb2_ref[1], preferred_element_type=f32)
            + jnp.dot(o_bot, wb2_ref[2], preferred_element_type=f32))
    res = batchnorm(acc2)
    res_ref[...] = res.astype(res_ref.dtype)

    # ---- ConvTranspose2d(k=2, s=2): one block-diagonal matmul + bias --------
    up = jnp.dot(res.astype(bf16), wbu_ref[...], preferred_element_type=f32) + bu_ref[...]
    up_ref[...] = up.astype(up_ref.dtype)


# ----------------------------------------------------------------------------
# Weight preprocessing (built once, outside the kernel).
# ----------------------------------------------------------------------------
def _banded_conv3x3(w_oihw, W):
    """Per-kh banded matrices (3, W*Ci, W*Co) folding the kw taps and W positions.

    Taps that fall outside [0, W) are simply not placed, which is exactly
    equivalent to padding=1 zero padding in the W direction.
    """
    wk = jnp.transpose(w_oihw, (2, 3, 1, 0))      # (3, 3, Ci, Co)
    mats = []
    for kh in range(3):
        m = sum(jnp.kron(jnp.eye(W, k=-(kw - 1), dtype=w_oihw.dtype), wk[kh, kw])
                for kw in range(3))
        mats.append(m)
    return jnp.stack(mats, axis=0)


def simpleblockexpand_forward(x_nchw, w_conv1, w_conv2, w_up, b_up):
    """x: (N, Cin, H, W); w_conv*: (C2, Ci, 3, 3); w_up: (C2, Cout, 2, 2)."""
    N, Cin, H, W = x_nchw.shape
    C2 = w_conv1.shape[0]
    Cout = w_up.shape[1]
    f32, bf16 = jnp.float32, jnp.bfloat16

    # Lane-dense (w, c)-fused rows; pre-pad the H halo once here.
    x_rows = jnp.transpose(x_nchw, (0, 2, 3, 1)).reshape(N, H, W * Cin)
    x_pad = jnp.pad(x_rows, ((0, 0), (1, 1), (0, 0))).astype(bf16)   # (N, H+2, W*Cin)

    wb1 = _banded_conv3x3(w_conv1, W).astype(bf16)     # (3, W*Cin, W*C2)
    wb2 = _banded_conv3x3(w_conv2, W).astype(bf16)     # (3, W*C2,  W*C2)

    # Block-diagonal ConvTranspose2d weight; per-pixel column order (kh, kw, co).
    k_up = jnp.transpose(w_up, (0, 2, 3, 1)).reshape(C2, 4 * Cout)
    wbu = jnp.kron(jnp.eye(W, dtype=f32), k_up).astype(bf16)          # (W*C2, W*4*Cout)
    bu = jnp.tile(b_up, W * 4).reshape(1, W * 4 * Cout).astype(f32)

    # 0/1 per-channel collapse / broadcast matrices for the fused-lane BN stats.
    expand = jnp.kron(jnp.ones((W, 1), f32), jnp.eye(C2, dtype=f32))  # (W*C2, C2)
    spread = expand.T                                                 # (C2, W*C2)

    NH, WCin, WC2, UPW = N * H, W * Cin, W * C2, W * 4 * Cout
    flops = 2 * NH * (3 * WCin * WC2 + 3 * WC2 * WC2 + WC2 * UPW)
    bytes_accessed = (x_pad.size * 2 + wb1.size * 2 + wb2.size * 2 + wbu.size * 2
                      + bu.size * 4 + expand.size * 4 + spread.size * 4
                      + NH * WC2 * 4 + NH * UPW * 4)

    kern = functools.partial(_fused_kernel, N=N, H=H, W=W, Cin=Cin, C2=C2)
    res2d, up2d = pl.pallas_call(
        kern,
        out_shape=(jax.ShapeDtypeStruct((NH, WC2), f32),
                   jax.ShapeDtypeStruct((NH, UPW), f32)),
        scratch_shapes=[pltpu.VMEM((N, H + 2, WC2), bf16)],  # H-padded conv2 input
        cost_estimate=pl.CostEstimate(flops=flops, transcendentals=4 * C2,
                                      bytes_accessed=bytes_accessed),
    )(x_pad, wb1, wb2, wbu, bu, expand, spread)

    # Single reshape+transpose per output back to PyTorch NCHW.
    residual = res2d.reshape(N, H, W, C2).transpose(0, 3, 1, 2)
    up = (up2d.reshape(N, H, W, 2, 2, Cout)
          .transpose(0, 5, 1, 3, 2, 4)
          .reshape(N, Cout, 2 * H, 2 * W))
    return residual, up


# ----------------------------------------------------------------------------
# Pure-JAX f32 reference (same training-mode BN semantics) for correctness.
# ----------------------------------------------------------------------------
def _reference_forward(x, w1, w2, wu, bu):
    dn = ("NCHW", "OIHW", "NCHW")

    def conv(v, w):
        return jax.lax.conv_general_dilated(
            v, w, window_strides=(1, 1), padding=((1, 1), (1, 1)),
            dimension_numbers=dn)

    def bn(v):
        mean = jnp.mean(v, axis=(0, 2, 3), keepdims=True)
        var = jnp.mean(jnp.square(v - mean), axis=(0, 2, 3), keepdims=True)
        return (v - mean) * jax.lax.rsqrt(var + BN_EPS)

    o = jnp.maximum(bn(conv(x, w1)), 0.0)
    res = bn(conv(o, w2))
    Nb, _, Hh, Ww = res.shape
    Co = wu.shape[1]
    up = jnp.einsum("nchw,cokl->nohkwl", res, wu).reshape(Nb, Co, 2 * Hh, 2 * Ww)
    up = up + bu[None, :, None, None]
    return res, up


if __name__ == "__main__":
    # Shapes consistent with the module: in_channels=4, out_channels=4 -> C2=8.
    N, Cin, H, W = 2, 4, 16, 16
    Cout = 4
    C2 = 2 * Cout

    key = jax.random.PRNGKey(0)
    k_x, k_w1, k_w2, k_wu, k_bu = jax.random.split(key, 5)
    x = jax.random.normal(k_x, (N, Cin, H, W), jnp.float32)
    w_conv1 = jax.random.normal(k_w1, (C2, Cin, 3, 3), jnp.float32) * 0.1
    w_conv2 = jax.random.normal(k_w2, (C2, C2, 3, 3), jnp.float32) * 0.1
    w_up = jax.random.normal(k_wu, (C2, Cout, 2, 2), jnp.float32) * 0.1
    b_up = jax.random.normal(k_bu, (Cout,), jnp.float32) * 0.1

    residual, up = jax.jit(simpleblockexpand_forward)(x, w_conv1, w_conv2, w_up, b_up)
    jax.block_until_ready((residual, up))
    assert residual.shape == (N, C2, H, W), residual.shape
    assert up.shape == (N, Cout, 2 * H, 2 * W), up.shape

    res_gold, up_gold = jax.jit(_reference_forward)(x, w_conv1, w_conv2, w_up, b_up)
    err_res = float(jnp.max(jnp.abs(residual - res_gold)))
    err_up = float(jnp.max(jnp.abs(up - up_gold)))
    # bf16 matmul operands (f32 accumulation) loosen the tolerance vs the f32 ref.
    assert err_res < 1e-1 and err_up < 1e-1, (err_res, err_up)

    print("KERNEL_OK")
</pallas_src>

<mosaic_0001>
module attributes {stable_mosaic.version = 11 : i64} {
  func.func @_fused_kernel(%arg0: memref<2x18x64xbf16, #tpu.memory_space<vmem>>, %arg1: memref<3x64x128xbf16, #tpu.memory_space<vmem>>, %arg2: memref<3x128x128xbf16, #tpu.memory_space<vmem>>, %arg3: memref<128x256xbf16, #tpu.memory_space<vmem>>, %arg4: memref<1x256xf32, #tpu.memory_space<vmem>>, %arg5: memref<128x8xf32, #tpu.memory_space<vmem>>, %arg6: memref<8x128xf32, #tpu.memory_space<vmem>>, %arg7: memref<32x128xf32, #tpu.memory_space<vmem>>, %arg8: memref<32x256xf32, #tpu.memory_space<vmem>>, %arg9: memref<2x18x128xbf16, #tpu.memory_space<vmem>>) attributes {dimension_semantics = [], scalar_prefetch = 0 : i64, scratch_operands = 1 : i64, tpu.core_type = #tpu.core_type<tc>} {
    %c0 = arith.constant 0 : index
    %c0_0 = arith.constant 0 : index
    %0 = vector.load %arg5[%c0, %c0_0] : memref<128x8xf32, #tpu.memory_space<vmem>>, vector<128x8xf32>
    %c0_1 = arith.constant 0 : index
    %c0_2 = arith.constant 0 : index
    %1 = vector.load %arg6[%c0_1, %c0_2] : memref<8x128xf32, #tpu.memory_space<vmem>>, vector<8x128xf32>
    %c0_3 = arith.constant 0 : index
    %c0_4 = arith.constant 0 : index
    %c0_5 = arith.constant 0 : index
    %2 = vector.load %arg0[%c0_3, %c0_4, %c0_5] : memref<2x18x64xbf16, #tpu.memory_space<vmem>>, vector<2x16x64xbf16>
    %3 = vector.shape_cast %2 : vector<2x16x64xbf16> to vector<32x64xbf16>
    %c0_6 = arith.constant 0 : index
    %c1 = arith.constant 1 : index
    %c0_7 = arith.constant 0 : index
    %4 = vector.load %arg0[%c0_6, %c1, %c0_7] : memref<2x18x64xbf16, #tpu.memory_space<vmem>>, vector<2x16x64xbf16>
    %5 = vector.shape_cast %4 : vector<2x16x64xbf16> to vector<32x64xbf16>
    %c0_8 = arith.constant 0 : index
    %c2 = arith.constant 2 : index
    %c0_9 = arith.constant 0 : index
    %6 = vector.load %arg0[%c0_8, %c2, %c0_9] : memref<2x18x64xbf16, #tpu.memory_space<vmem>>, vector<2x16x64xbf16>
    %7 = vector.shape_cast %6 : vector<2x16x64xbf16> to vector<32x64xbf16>
    %c0_10 = arith.constant 0 : index
    %c0_11 = arith.constant 0 : index
    %c0_12 = arith.constant 0 : index
    %8 = vector.load %arg1[%c0_10, %c0_11, %c0_12] : memref<3x64x128xbf16, #tpu.memory_space<vmem>>, vector<1x64x128xbf16>
    %9 = vector.shape_cast %8 : vector<1x64x128xbf16> to vector<64x128xbf16>
    %cst = arith.constant dense<0.000000e+00> : vector<32x128xf32>
    %10 = tpu.matmul %3, %9, %cst {dimension_numbers = #tpu.dot_dimension_numbers<[1], [0], [0], [1], [0, 0, 1, 1], [], []>} : vector<32x64xbf16>, vector<64x128xbf16>, vector<32x128xf32> -> vector<32x128xf32>
    %c1_13 = arith.constant 1 : index
    %c0_14 = arith.constant 0 : index
    %c0_15 = arith.constant 0 : index
    %11 = vector.load %arg1[%c1_13, %c0_14, %c0_15] : memref<3x64x128xbf16, #tpu.memory_space<vmem>>, vector<1x64x128xbf16>
    %12 = vector.shape_cast %11 : vector<1x64x128xbf16> to vector<64x128xbf16>
    %cst_16 = arith.constant dense<0.000000e+00> : vector<32x128xf32>
    %13 = tpu.matmul %5, %12, %cst_16 {dimension_numbers = #tpu.dot_dimension_numbers<[1], [0], [0], [1], [0, 0, 1, 1], [], []>} : vector<32x64xbf16>, vector<64x128xbf16>, vector<32x128xf32> -> vector<32x128xf32>
    %14 = arith.addf %10, %13 : vector<32x128xf32>
    %c2_17 = arith.constant 2 : index
    %c0_18 = arith.constant 0 : index
    %c0_19 = arith.constant 0 : index
    %15 = vector.load %arg1[%c2_17, %c0_18, %c0_19] : memref<3x64x128xbf16, #tpu.memory_space<vmem>>, vector<1x64x128xbf16>
    %16 = vector.shape_cast %15 : vector<1x64x128xbf16> to vector<64x128xbf16>
    %cst_20 = arith.constant dense<0.000000e+00> : vector<32x128xf32>
    %17 = tpu.matmul %7, %16, %cst_20 {dimension_numbers = #tpu.dot_dimension_numbers<[1], [0], [0], [1], [0, 0, 1, 1], [], []>} : vector<32x64xbf16>, vector<64x128xbf16>, vector<32x128xf32> -> vector<32x128xf32>
    %18 = arith.addf %14, %17 : vector<32x128xf32>
    %cst_21 = arith.constant dense<0.000000e+00> : vector<128xf32>
    %19 = vector.multi_reduction <add>, %18, %cst_21 [0] : vector<32x128xf32> to vector<128xf32>
    %20 = vector.shape_cast %19 : vector<128xf32> to vector<1x128xf32>
    %21 = arith.mulf %18, %18 : vector<32x128xf32>
    %cst_22 = arith.constant dense<0.000000e+00> : vector<128xf32>
    %22 = vector.multi_reduction <add>, %21, %cst_22 [0] : vector<32x128xf32> to vector<128xf32>
    %23 = vector.shape_cast %22 : vector<128xf32> to vector<1x128xf32>
    %24 = tpu.iota {dimensions = array<i32: 0>} : vector<2x128xi32>
    %c0_i32 = arith.constant 0 : i32
    %25 = vector.broadcast %c0_i32 : i32 to vector<2x128xi32>
    %26 = arith.cmpi eq, %24, %25 : vector<2x128xi32>
    %27 = vector.shape_cast %20 : vector<1x128xf32> to vector<1x128xf32>
    %28 = vector.broadcast %27 : vector<1x128xf32> to vector<2x128xf32>
    %29 = vector.shape_cast %23 : vector<1x128xf32> to vector<1x128xf32>
    %30 = vector.broadcast %29 : vector<1x128xf32> to vector<2x128xf32>
    %31 = arith.select %26, %28, %30 : vector<2x128xi1>, vector<2x128xf32>
    %cst_23 = arith.constant dense<0.000000e+00> : vector<2x8xf32>
    %32 = tpu.matmul %31, %0, %cst_23 {dimension_numbers = #tpu.dot_dimension_numbers<[1], [0], [0], [1], [0, 0, 1, 1], [], []>} : vector<2x128xf32>, vector<128x8xf32>, vector<2x8xf32> -> vector<2x8xf32>
    %33 = vector.extract_strided_slice %32 {offsets = [0, 0], sizes = [1, 8], strides = [1, 1]} : vector<2x8xf32> to vector<1x8xf32>
    %cst_24 = arith.constant 0.001953125 : f32
    %34 = vector.broadcast %cst_24 : f32 to vector<1x8xf32>
    %35 = arith.mulf %33, %34 : vector<1x8xf32>
    %36 = vector.extract_strided_slice %32 {offsets = [1, 0], sizes = [1, 8], strides = [1, 1]} : vector<2x8xf32> to vector<1x8xf32>
    %cst_25 = arith.constant 0.001953125 : f32
    %37 = vector.broadcast %cst_25 : f32 to vector<1x8xf32>
    %38 = arith.mulf %36, %37 : vector<1x8xf32>
    %39 = arith.mulf %35, %35 : vector<1x8xf32>
    %40 = arith.subf %38, %39 : vector<1x8xf32>
    %cst_26 = arith.constant 0.000000e+00 : f32
    %41 = vector.broadcast %cst_26 : f32 to vector<1x8xf32>
    %42 = arith.maximumf %40, %41 : vector<1x8xf32>
    %cst_27 = arith.constant 9.99999974E-6 : f32
    %43 = vector.broadcast %cst_27 : f32 to vector<1x8xf32>
    %44 = arith.addf %42, %43 : vector<1x8xf32>
    %45 = math.rsqrt %44 : vector<1x8xf32>
    %cst_28 = arith.constant 0.000000e+00 : f32
    %46 = vector.broadcast %cst_28 : f32 to vector<1x8xf32>
    %47 = arith.subf %46, %35 : vector<1x8xf32>
    %48 = arith.mulf %47, %45 : vector<1x8xf32>
    %49 = tpu.iota {dimensions = array<i32: 0>} : vector<2x8xi32>
    %c0_i32_29 = arith.constant 0 : i32
    %50 = vector.broadcast %c0_i32_29 : i32 to vector<2x8xi32>
    %51 = arith.cmpi eq, %49, %50 : vector<2x8xi32>
    %52 = vector.shape_cast %45 : vector<1x8xf32> to vector<1x8xf32>
    %53 = vector.broadcast %52 : vector<1x8xf32> to vector<2x8xf32>
    %54 = vector.shape_cast %48 : vector<1x8xf32> to vector<1x8xf32>
    %55 = vector.broadcast %54 : vector<1x8xf32> to vector<2x8xf32>
    %56 = arith.select %51, %53, %55 : vector<2x8xi1>, vector<2x8xf32>
    %cst_30 = arith.constant dense<0.000000e+00> : vector<2x128xf32>
    %57 = tpu.matmul %56, %1, %cst_30 {dimension_numbers = #tpu.dot_dimension_numbers<[1], [0], [0], [1], [0, 0, 1, 1], [], []>} : vector<2x8xf32>, vector<8x128xf32>, vector<2x128xf32> -> vector<2x128xf32>
    %58 = vector.extract_strided_slice %57 {offsets = [0, 0], sizes = [1, 128], strides = [1, 1]} : vector<2x128xf32> to vector<1x128xf32>
    %59 = vector.broadcast %58 : vector<1x128xf32> to vector<32x128xf32>
    %60 = arith.mulf %18, %59 : vector<32x128xf32>
    %61 = vector.extract_strided_slice %57 {offsets = [1, 0], sizes = [1, 128], strides = [1, 1]} : vector<2x128xf32> to vector<1x128xf32>
    %62 = vector.broadcast %61 : vector<1x128xf32> to vector<32x128xf32>
    %63 = arith.addf %60, %62 : vector<32x128xf32>
    %cst_31 = arith.constant 0.000000e+00 : f32
    %64 = vector.broadcast %cst_31 : f32 to vector<32x128xf32>
    %65 = arith.maximumf %63, %64 : vector<32x128xf32>
    %66 = arith.truncf %65 : vector<32x128xf32> to vector<32x128xbf16>
    %cst_32 = arith.constant 0.000000e+00 : bf16
    %67 = vector.broadcast %cst_32 : bf16 to vector<2x1x128xbf16>
    %c0_33 = arith.constant 0 : index
    %c0_34 = arith.constant 0 : index
    %c0_35 = arith.constant 0 : index
    %68 = vector.load %arg9[%c0_33, %c0_34, %c0_35] : memref<2x18x128xbf16, #tpu.memory_space<vmem>>, vector<2x1x128xbf16>
    tpu.vector_store %arg9[%c0_33, %c0_34, %c0_35], %67 {strides = array<i32>} : memref<2x18x128xbf16, #tpu.memory_space<vmem>>, vector<2x1x128xbf16>,
    %cst_36 = arith.constant 0.000000e+00 : bf16
    %69 = vector.broadcast %cst_36 : bf16 to vector<2x1x128xbf16>
    %c0_37 = arith.constant 0 : index
    %c17 = arith.constant 17 : index
    %c0_38 = arith.constant 0 : index
    %70 = vector.load %arg9[%c0_37, %c17, %c0_38] : memref<2x18x128xbf16, #tpu.memory_space<vmem>>, vector<2x1x128xbf16>
    tpu.vector_store %arg9[%c0_37, %c17, %c0_38], %69 {strides = array<i32>} : memref<2x18x128xbf16, #tpu.memory_space<vmem>>, vector<2x1x128xbf16>,
    %71 = vector.shape_cast %66 : vector<32x128xbf16> to vector<2x16x128xbf16>
    %c0_39 = arith.constant 0 : index
    %c1_40 = arith.constant 1 : index
    %c0_41 = arith.constant 0 : index
    %72 = vector.load %arg9[%c0_39, %c1_40, %c0_41] : memref<2x18x128xbf16, #tpu.memory_space<vmem>>, vector<2x16x128xbf16>
    tpu.vector_store %arg9[%c0_39, %c1_40, %c0_41], %71 {strides = array<i32>} : memref<2x18x128xbf16, #tpu.memory_space<vmem>>, vector<2x16x128xbf16>,
    %c0_42 = arith.constant 0 : index
    %c0_43 = arith.constant 0 : index
    %c0_44 = arith.constant 0 : index
    %73 = vector.load %arg9[%c0_42, %c0_43, %c0_44] : memref<2x18x128xbf16, #tpu.memory_space<vmem>>, vector<2x16x128xbf16>
    %74 = vector.shape_cast %73 : vector<2x16x128xbf16> to vector<32x128xbf16>
    %c0_45 = arith.constant 0 : index
    %c2_46 = arith.constant 2 : index
    %c0_47 = arith.constant 0 : index
    %75 = vector.load %arg9[%c0_45, %c2_46, %c0_47] : memref<2x18x128xbf16, #tpu.memory_space<vmem>>, vector<2x16x128xbf16>
    %76 = vector.shape_cast %75 : vector<2x16x128xbf16> to vector<32x128xbf16>
    %c0_48 = arith.constant 0 : index
    %c0_49 = arith.constant 0 : index
    %c0_50 = arith.constant 0 : index
    %77 = vector.load %arg2[%c0_48, %c0_49, %c0_50] : memref<3x128x128xbf16, #tpu.memory_space<vmem>>, vector<1x128x128xbf16>
    %78 = vector.shape_cast %77 : vector<1x128x128xbf16> to vector<128x128xbf16>
    %cst_51 = arith.constant dense<0.000000e+00> : vector<32x128xf32>
    %79 = tpu.matmul %74, %78, %cst_51 {dimension_numbers = #tpu.dot_dimension_numbers<[1], [0], [0], [1], [0, 0, 1, 1], [], []>} : vector<32x128xbf16>, vector<128x128xbf16>, vector<32x128xf32> -> vector<32x128xf32>
    %c1_52 = arith.constant 1 : index
    %c0_53 = arith.constant 0 : index
    %c0_54 = arith.constant 0 : index
    %80 = vector.load %arg2[%c1_52, %c0_53, %c0_54] : memref<3x128x128xbf16, #tpu.memory_space<vmem>>, vector<1x128x128xbf16>
    %81 = vector.shape_cast %80 : vector<1x128x128xbf16> to vector<128x128xbf16>
    %cst_55 = arith.constant dense<0.000000e+00> : vector<32x128xf32>
    %82 = tpu.matmul %66, %81, %cst_55 {dimension_numbers = #tpu.dot_dimension_numbers<[1], [0], [0], [1], [0, 0, 1, 1], [], []>} : vector<32x128xbf16>, vector<128x128xbf16>, vector<32x128xf32> -> vector<32x128xf32>
    %83 = arith.addf %79, %82 : vector<32x128xf32>
    %c2_56 = arith.constant 2 : index
    %c0_57 = arith.constant 0 : index
    %c0_58 = arith.constant 0 : index
    %84 = vector.load %arg2[%c2_56, %c0_57, %c0_58] : memref<3x128x128xbf16, #tpu.memory_space<vmem>>, vector<1x128x128xbf16>
    %85 = vector.shape_cast %84 : vector<1x128x128xbf16> to vector<128x128xbf16>
    %cst_59 = arith.constant dense<0.000000e+00> : vector<32x128xf32>
    %86 = tpu.matmul %76, %85, %cst_59 {dimension_numbers = #tpu.dot_dimension_numbers<[1], [0], [0], [1], [0, 0, 1, 1], [], []>} : vector<32x128xbf16>, vector<128x128xbf16>, vector<32x128xf32> -> vector<32x128xf32>
    %87 = arith.addf %83, %86 : vector<32x128xf32>
    %cst_60 = arith.constant dense<0.000000e+00> : vector<128xf32>
    %88 = vector.multi_reduction <add>, %87, %cst_60 [0] : vector<32x128xf32> to vector<128xf32>
    %89 = vector.shape_cast %88 : vector<128xf32> to vector<1x128xf32>
    %90 = arith.mulf %87, %87 : vector<32x128xf32>
    %cst_61 = arith.constant dense<0.000000e+00> : vector<128xf32>
    %91 = vector.multi_reduction <add>, %90, %cst_61 [0] : vector<32x128xf32> to vector<128xf32>
    %92 = vector.shape_cast %91 : vector<128xf32> to vector<1x128xf32>
    %93 = tpu.iota {dimensions = array<i32: 0>} : vector<2x128xi32>
    %c0_i32_62 = arith.constant 0 : i32
    %94 = vector.broadcast %c0_i32_62 : i32 to vector<2x128xi32>
    %95 = arith.cmpi eq, %93, %94 : vector<2x128xi32>
    %96 = vector.shape_cast %89 : vector<1x128xf32> to vector<1x128xf32>
    %97 = vector.broadcast %96 : vector<1x128xf32> to vector<2x128xf32>
    %98 = vector.shape_cast %92 : vector<1x128xf32> to vector<1x128xf32>
    %99 = vector.broadcast %98 : vector<1x128xf32> to vector<2x128xf32>
    %100 = arith.select %95, %97, %99 : vector<2x128xi1>, vector<2x128xf32>
    %cst_63 = arith.constant dense<0.000000e+00> : vector<2x8xf32>
    %101 = tpu.matmul %100, %0, %cst_63 {dimension_numbers = #tpu.dot_dimension_numbers<[1], [0], [0], [1], [0, 0, 1, 1], [], []>} : vector<2x128xf32>, vector<128x8xf32>, vector<2x8xf32> -> vector<2x8xf32>
    %102 = vector.extract_strided_slice %101 {offsets = [0, 0], sizes = [1, 8], strides = [1, 1]} : vector<2x8xf32> to vector<1x8xf32>
    %cst_64 = arith.constant 0.001953125 : f32
    %103 = vector.broadcast %cst_64 : f32 to vector<1x8xf32>
    %104 = arith.mulf %102, %103 : vector<1x8xf32>
    %105 = vector.extract_strided_slice %101 {offsets = [1, 0], sizes = [1, 8], strides = [1, 1]} : vector<2x8xf32> to vector<1x8xf32>
    %cst_65 = arith.constant 0.001953125 : f32
    %106 = vector.broadcast %cst_65 : f32 to vector<1x8xf32>
    %107 = arith.mulf %105, %106 : vector<1x8xf32>
    %108 = arith.mulf %104, %104 : vector<1x8xf32>
    %109 = arith.subf %107, %108 : vector<1x8xf32>
    %cst_66 = arith.constant 0.000000e+00 : f32
    %110 = vector.broadcast %cst_66 : f32 to vector<1x8xf32>
    %111 = arith.maximumf %109, %110 : vector<1x8xf32>
    %cst_67 = arith.constant 9.99999974E-6 : f32
    %112 = vector.broadcast %cst_67 : f32 to vector<1x8xf32>
    %113 = arith.addf %111, %112 : vector<1x8xf32>
    %114 = math.rsqrt %113 : vector<1x8xf32>
    %cst_68 = arith.constant 0.000000e+00 : f32
    %115 = vector.broadcast %cst_68 : f32 to vector<1x8xf32>
    %116 = arith.subf %115, %104 : vector<1x8xf32>
    %117 = arith.mulf %116, %114 : vector<1x8xf32>
    %118 = tpu.iota {dimensions = array<i32: 0>} : vector<2x8xi32>
    %c0_i32_69 = arith.constant 0 : i32
    %119 = vector.broadcast %c0_i32_69 : i32 to vector<2x8xi32>
    %120 = arith.cmpi eq, %118, %119 : vector<2x8xi32>
    %121 = vector.shape_cast %114 : vector<1x8xf32> to vector<1x8xf32>
    %122 = vector.broadcast %121 : vector<1x8xf32> to vector<2x8xf32>
    %123 = vector.shape_cast %117 : vector<1x8xf32> to vector<1x8xf32>
    %124 = vector.broadcast %123 : vector<1x8xf32> to vector<2x8xf32>
    %125 = arith.select %120, %122, %124 : vector<2x8xi1>, vector<2x8xf32>
    %cst_70 = arith.constant dense<0.000000e+00> : vector<2x128xf32>
    %126 = tpu.matmul %125, %1, %cst_70 {dimension_numbers = #tpu.dot_dimension_numbers<[1], [0], [0], [1], [0, 0, 1, 1], [], []>} : vector<2x8xf32>, vector<8x128xf32>, vector<2x128xf32> -> vector<2x128xf32>
    %127 = vector.extract_strided_slice %126 {offsets = [0, 0], sizes = [1, 128], strides = [1, 1]} : vector<2x128xf32> to vector<1x128xf32>
    %128 = vector.broadcast %127 : vector<1x128xf32> to vector<32x128xf32>
    %129 = arith.mulf %87, %128 : vector<32x128xf32>
    %130 = vector.extract_strided_slice %126 {offsets = [1, 0], sizes = [1, 128], strides = [1, 1]} : vector<2x128xf32> to vector<1x128xf32>
    %131 = vector.broadcast %130 : vector<1x128xf32> to vector<32x128xf32>
    %132 = arith.addf %129, %131 : vector<32x128xf32>
    %c0_71 = arith.constant 0 : index
    %c0_72 = arith.constant 0 : index
    %133 = vector.load %arg7[%c0_71, %c0_72] : memref<32x128xf32, #tpu.memory_space<vmem>>, vector<32x128xf32>
    tpu.vector_store %arg7[%c0_71, %c0_72], %132 {strides = array<i32>} : memref<32x128xf32, #tpu.memory_space<vmem>>, vector<32x128xf32>,
    %134 = arith.truncf %132 : vector<32x128xf32> to vector<32x128xbf16>
    %c0_73 = arith.constant 0 : index
    %c0_74 = arith.constant 0 : index
    %135 = vector.load %arg3[%c0_73, %c0_74] : memref<128x256xbf16, #tpu.memory_space<vmem>>, vector<128x256xbf16>
    %cst_75 = arith.constant dense<0.000000e+00> : vector<32x256xf32>
    %136 = tpu.matmul %134, %135, %cst_75 {dimension_numbers = #tpu.dot_dimension_numbers<[1], [0], [0], [1], [0, 0, 1, 1], [], []>} : vector<32x128xbf16>, vector<128x256xbf16>, vector<32x256xf32> -> vector<32x256xf32>
    %c0_76 = arith.constant 0 : index
    %c0_77 = arith.constant 0 : index
    %137 = vector.load %arg4[%c0_76, %c0_77] : memref<1x256xf32, #tpu.memory_space<vmem>>, vector<1x256xf32>
    %138 = vector.broadcast %137 : vector<1x256xf32> to vector<32x256xf32>
    %139 = arith.addf %136, %138 : vector<32x256xf32>
    %c0_78 = arith.constant 0 : index
    %c0_79 = arith.constant 0 : index
    %140 = vector.load %arg8[%c0_78, %c0_79] : memref<32x256xf32, #tpu.memory_space<vmem>>, vector<32x256xf32>
    tpu.vector_store %arg8[%c0_78, %c0_79], %139 {strides = array<i32>} : memref<32x256xf32, #tpu.memory_space<vmem>>, vector<32x256xf32>,
    return
  }
}

</mosaic_0001>

<bundles_post_ra>
// kernel: tile.8
= control target key start
LH: loop header
LB: loop body
LE: loop exit
PB: predicated region body
PF: predicated region fallthrough
CT: control target
= control target key end

     0   :  { %s64_s0 = inlined_call_operand.vmem [shape: f32[4], index: 0, kind: input, shape index: {}]   ;;  %s65_s1 = inlined_call_operand.vmem [shape: f32[64,4], index: 1, kind: output, shape index: {}]  }
   0x1   :  { %v4_v0 = vld [vmem:[%s64_s0] ss:$0 sm:$0xff] }
   0x2   :  { %5 = vst [vmem:[%s65_s1] sm:$0xff] %v4_v0  ;;  %20 = vst [vmem:[%s65_s1 + $0x8] sm:$0xff] %v4_v0 }
   0x3   :  { %21 = vst [vmem:[%s65_s1 + $0x10] sm:$0xff] %v4_v0  ;;  %22 = vst [vmem:[%s65_s1 + $0x18] sm:$0xff] %v4_v0 }
   0x4   :  { %23 = vst [vmem:[%s65_s1 + $0x20] sm:$0xff] %v4_v0  ;;  %24 = vst [vmem:[%s65_s1 + $0x28] sm:$0xff] %v4_v0 }
   0x5   :  { %25 = vst [vmem:[%s65_s1 + $0x30] sm:$0xff] %v4_v0  ;;  %26 = vst [vmem:[%s65_s1 + $0x38] sm:$0xff] %v4_v0 }

// kernel: tile.9
= control target key start
LH: loop header
LB: loop body
LE: loop exit
PB: predicated region body
PF: predicated region fallthrough
CT: control target
= control target key end

     0   :  { %vm5_vm0 = vcmask 1041409   ;;  %s428_s14 = smov 124   ;;  %s429_s21 = smov 116   ;;  %vm7_vm1 = vcmask 31744   ;;  %vm17_vm2 = vcmask 1048544   ;;  %vm27_vm3 = vcmask 1015744   ;;  %s699_s0 = inlined_call_operand.vmem [shape: f32[64,4], index: 0, kind: input, shape index: {}]   ;;  %s700_s1 = inlined_call_operand.vmem [shape: f32[1,256], index: 1, kind: output, shape index: {}]  }
   0x1   :  { %v334_v0 = vld [vmem:[%s699_s0 + $0x1f] sm:$0x1]   ;;  %v338_v3 = vld [vmem:[%s699_s0 + $0x1d] sm:$0x1]   ;;  %v336_v6 = vld [vmem:[%s699_s0 + $0x1e] sm:$0x1]  }
   0x2   :  { %v335_v1 = vld [vmem:[%s699_s0 + $0x3e] sm:$0x2]   ;;  %v339_v4 = vld [vmem:[%s699_s0 + $0x3c] sm:$0x2]   ;;  %v337_v7 = vld [vmem:[%s699_s0 + $0x3d] sm:$0x2]  }
   0x3   :  { %v14_v2 = vsel %vm5_vm0, %v335_v1, %v334_v0  ;;  %v34_v5 = vsel %vm5_vm0, %v339_v4, %v338_v3  ;;  %v340_v8 = vld [vmem:[%s699_s0 + $0x1c] sm:$0x1]   ;;  %v24_v9 = vsel %vm5_vm0, %v337_v7, %v336_v6  ;;  %v342_v12 = vld [vmem:[%s699_s0 + $0x1b] sm:$0x1]   ;;  %v344_v14 = vld [vmem:[%s699_s0 + $0x1a] sm:$0x1]  }
   0x4   :  { %15 = vrot.lane.b32.xlu0 %v14_v2, %s428_s14  ;;  %35 = vrot.lane.b32.xlu1 %v34_v5, %s429_s21  ;;  %v341_v10 = vld [vmem:[%s699_s0 + $0x3b] sm:$0x2]   ;;  %v343_v13 = vld [vmem:[%s699_s0 + $0x3a] sm:$0x2]   ;;  %s430_s3 = smov 120   ;;  %s431_s4 = smov 112  }
   0x5   :  { %v44_v11 = vsel %vm5_vm0, %v341_v10, %v340_v8  ;;  %v345_v15 = vld [vmem:[%s699_s0 + $0x39] sm:$0x2]   ;;  %v54_v16 = vsel %vm5_vm0, %v343_v13, %v342_v12  ;;  %v346_v18 = vld [vmem:[%s699_s0 + $0x19] sm:$0x1]   ;;  %v348_v20 = vld [vmem:[%s699_s0 + $0x18] sm:$0x1]  }
   0x6   :  { %v64_v17 = vsel %vm5_vm0, %v345_v15, %v344_v14  ;;  %v347_v19 = vld [vmem:[%s699_s0 + $0x38] sm:$0x2]   ;;  %v349_v21 = vld [vmem:[%s699_s0 + $0x37] sm:$0x2]   ;;  %s432_s13 = smov 108   ;;  %s433_s14 = smov 104  }
   0x7   :  { %v74_v22 = vsel %vm5_vm0, %v347_v19, %v346_v18  ;;  %v84_v23 = vsel %vm5_vm0, %v349_v21, %v348_v20  ;;  %v350_v24 = vld [vmem:[%s699_s0 + $0x17] sm:$0x1]   ;;  %v352_v26 = vld [vmem:[%s699_s0 + $0x16] sm:$0x1]   ;;  %s434_s23 = smov 100   ;;  %s435_s24 = smov 96  }
   0x8   :  { %25 = vrot.lane.b32.xlu0 %v24_v9, %s430_s3  ;;  %45 = vrot.lane.b32.xlu1 %v44_v11, %s431_s4  ;;  %v351_v25 = vld [vmem:[%s699_s0 + $0x36] sm:$0x2]   ;;  %v353_v27 = vld [vmem:[%s699_s0 + $0x35] sm:$0x2]   ;;  %s436_s4 = smov 92   ;;  %s437_s5 = smov 88  }
   0x9   :  { %v94_v28 = vsel %vm5_vm0, %v351_v25, %v350_v24  ;;  %v104_v29 = vsel %vm5_vm0, %v353_v27, %v352_v26  ;;  %v354_v30 = vld [vmem:[%s699_s0 + $0x15] sm:$0x1]   ;;  %v356_v32 = vld [vmem:[%s699_s0 + $0x14] sm:$0x1]   ;;  %v358_v36 = vld [vmem:[%s699_s0 + $0x13] sm:$0x1]  }
   0xa   :  { %v355_v31 = vld [vmem:[%s699_s0 + $0x34] sm:$0x2]   ;;  %v357_v33 = vld [vmem:[%s699_s0 + $0x33] sm:$0x2]   ;;  %v359_v37 = vld [vmem:[%s699_s0 + $0x32] sm:$0x2]  }
   0xb   :  { %v114_v34 = vsel %vm5_vm0, %v355_v31, %v354_v30  ;;  %v124_v35 = vsel %vm5_vm0, %v357_v33, %v356_v32  ;;  %v360_v38 = vld [vmem:[%s699_s0 + $0x12] sm:$0x1]   ;;  %s439_s15 = smov 80   ;;  %v134_v40 = vsel %vm5_vm0, %v359_v37, %v358_v36  ;;  %v362_v42 = vld [vmem:[%s699_s0 + $0x11] sm:$0x1]   ;;  %s441_s29 = smov 72  }
   0xc   :  { %55 = vrot.lane.b32.xlu0 %v54_v16, %s432_s13  ;;  %65 = vrot.lane.b32.xlu1 %v64_v17, %s433_s14  ;;  %v361_v39 = vld [vmem:[%s699_s0 + $0x31] sm:$0x2]   ;;  %s438_s14 = smov 84   ;;  %v363_v43 = vld [vmem:[%s699_s0 + $0x30] sm:$0x2]   ;;  %s442_s9 = smov 68  }
   0xd   :  { %v144_v41 = vsel %vm5_vm0, %v361_v39, %v360_v38  ;;  %v364_v44 = vld [vmem:[%s699_s0 + $0x10] sm:$0x1]   ;;  %v2_v46 = vld [vmem:[%s699_s0] sm:$0x1]   ;;  %v154_v48 = vsel %vm5_vm0, %v363_v43, %v362_v42  ;;  %v366_v51 = vld [vmem:[%s699_s0 + $0xf] sm:$0x1]  }
   0xe   :  { %v365_v45 = vld [vmem:[%s699_s0 + $0x2f] sm:$0x2]   ;;  %v333_v47 = vld [vmem:[%s699_s0 + $0x1f] sm:$0x2]   ;;  %v367_v52 = vld [vmem:[%s699_s0 + $0x2e] sm:$0x2]  }
   0xf   :  { %v6_v49 = vsel %vm5_vm0, %v333_v47, %v2_v46  ;;  %v164_v50 = vsel %vm5_vm0, %v365_v45, %v364_v44  ;;  %v368_v53 = vld [vmem:[%s699_s0 + $0xe] sm:$0x1]   ;;  %s443_s10 = smov 64   ;;  %v174_v55 = vsel %vm5_vm0, %v367_v52, %v366_v51  ;;  %v370_v57 = vld [vmem:[%s699_s0 + $0xd] sm:$0x1]   ;;  %s444_s19 = smov 60  }
  0x10   :  { %75 = vrot.lane.b32.xlu0 %v74_v22, %s434_s23  ;;  %85 = vrot.lane.b32.xlu1 %v84_v23, %s435_s24  ;;  %s440_s24 = smov 76   ;;  %8 = vst.msk [vmem:[#allocation0] ss:$8 sm:$0x3] %vm7_vm1, %v6_v49   ;;  %v369_v54 = vld [vmem:[%s699_s0 + $0x2d] sm:$0x2]  }
  0x11   :  { %v184_v56 = vsel %vm5_vm0, %v369_v54, %v368_v53  ;;  %v371_v58 = vld [vmem:[%s699_s0 + $0x2c] sm:$0x2]   ;;  %v372_v59 = vld [vmem:[%s699_s0 + $0xc] sm:$0x1]   ;;  %s445_s20 = smov 56   ;;  %s447_s30 = smov 48  }
  0x12   :  { %v373_v60 = vld [vmem:[%s699_s0 + $0x2b] sm:$0x2]   ;;  %v194_v61 = vsel %vm5_vm0, %v371_v58, %v370_v57  ;;  %v374_v63 = vld [vmem:[%s699_s0 + $0xb] sm:$0x1]   ;;  %v376_v1 = vld [vmem:[%s699_s0 + $0xa] sm:$0x1]  }
  0x13   :  { %v204_v62 = vsel %vm5_vm0, %v373_v60, %v372_v59  ;;  %v375_v0 = vld [vmem:[%s699_s0 + $0x2a] sm:$0x2]   ;;  %v377_v2 = vld [vmem:[%s699_s0 + $0x29] sm:$0x2]   ;;  %v378_v5 = vld [vmem:[%s699_s0 + $0x9] sm:$0x1]  }
  0x14   :  { %95 = vrot.lane.b32.xlu0 %v94_v28, %s436_s4  ;;  %105 = vrot.lane.b32.xlu1 %v104_v29, %s437_s5  ;;  %v214_v3 = vsel %vm5_vm0, %v375_v0, %v374_v63  ;;  %v224_v4 = vsel %vm5_vm0, %v377_v2, %v376_v1  ;;  %v379_v6 = vld [vmem:[%s699_s0 + $0x28] sm:$0x2]   ;;  %v380_v7 = vld [vmem:[%s699_s0 + $0x8] sm:$0x1]   ;;  %s449_s11 = smov 40   ;;  %s451_s21 = smov 32  }
  0x15   :  { %v381_v8 = vld [vmem:[%s699_s0 + $0x27] sm:$0x2]   ;;  %v234_v9 = vsel %vm5_vm0, %v379_v6, %v378_v5  ;;  %v382_v11 = vld [vmem:[%s699_s0 + $0x7] sm:$0x1]   ;;  %v384_v13 = vld [vmem:[%s699_s0 + $0x6] sm:$0x1]  }
  0x16   :  { %v244_v10 = vsel %vm5_vm0, %v381_v8, %v380_v7  ;;  %v383_v12 = vld [vmem:[%s699_s0 + $0x26] sm:$0x2]   ;;  %v385_v14 = vld [vmem:[%s699_s0 + $0x25] sm:$0x2]   ;;  %v386_v17 = vld [vmem:[%s699_s0 + $0x5] sm:$0x1]  }
  0x17   :  { %v254_v15 = vsel %vm5_vm0, %v383_v12, %v382_v11  ;;  %v264_v16 = vsel %vm5_vm0, %v385_v14, %v384_v13  ;;  %v387_v18 = vld [vmem:[%s699_s0 + $0x24] sm:$0x2]   ;;  %v388_v19 = vld [vmem:[%s699_s0 + $0x4] sm:$0x1]   ;;  %s453_s2 = smov 24   ;;  %s455_s12 = smov 16  }
  0x18   :  { %115 = vrot.lane.b32.xlu0 %v114_v34, %s438_s14  ;;  %125 = vrot.lane.b32.xlu1 %v124_v35, %s439_s15  ;;  %v389_v20 = vld [vmem:[%s699_s0 + $0x23] sm:$0x2]   ;;  %v274_v21 = vsel %vm5_vm0, %v387_v18, %v386_v17  ;;  %v390_v23 = vld [vmem:[%s699_s0 + $0x3] sm:$0x1]   ;;  %s457_s17 = smov 8   ;;  %s458_s18 = smov 4  }
  0x19   :  { %v284_v22 = vsel %vm5_vm0, %v389_v20, %v388_v19  ;;  %v391_v24 = vld [vmem:[%s699_s0 + $0x22] sm:$0x2]   ;;  %v392_v25 = vld [vmem:[%s699_s0 + $0x2] sm:$0x1]   ;;  %v394_v29 = vld [vmem:[%s699_s0 + $0x1] sm:$0x1]  }
  0x1a   :  { %v393_v26 = vld [vmem:[%s699_s0 + $0x21] sm:$0x2]   ;;  %v294_v27 = vsel %vm5_vm0, %v391_v24, %v390_v23  ;;  %v395_v30 = vld [vmem:[%s699_s0 + $0x20] sm:$0x2]   ;;  %s456_s0 = smov 12   ;;  %vm37_vm4 = vcmask 982944  }
  0x1b   :  { %v304_v28 = vsel %vm5_vm0, %v393_v26, %v392_v25  ;;  %v314_v31 = vsel %vm5_vm0, %v395_v30, %v394_v29  ;;  %vm47_vm5 = vcmask 950144   ;;  %vm57_vm6 = vcmask 917344  }
  0x1c   :  { %135 = vrot.lane.b32.xlu0 %v134_v40, %s440_s24  ;;  %145 = vrot.lane.b32.xlu1 %v144_v41, %s441_s29  ;;  %s446_s29 = smov 52   ;;  %vm67_vm7 = vcmask 884544   ;;  %vm77_vm8 = vcmask 851744   ;;  %vm87_vm9 = vcmask 818944   ;;  %vm97_vm10 = vcmask 786144  }
  0x1d   :  { %vm107_vm11 = vcmask 753344   ;;  %vm117_vm12 = vcmask 720544   ;;  %vm127_vm13 = vcmask 687744   ;;  %vm137_vm14 = vcmask 654944  }
  0x1e   :  { %vm147_vm15 = vcmask 622144   ;;  %vm157_vm0 = vcmask 589344   ;;  %vm167_vm1 = vcmask 556544  }
  0x20   :  { %155 = vrot.lane.b32.xlu0 %v154_v48, %s442_s9  ;;  %165 = vrot.lane.b32.xlu1 %v164_v50, %s443_s10  ;;  %s448_s10 = smov 44  }
  0x24   :  { %175 = vrot.lane.b32.xlu0 %v174_v55, %s444_s19  ;;  %185 = vrot.lane.b32.xlu1 %v184_v56, %s445_s20  ;;  %s450_s20 = smov 36  }
  0x28   :  { %195 = vrot.lane.b32.xlu0 %v194_v61, %s446_s29  ;;  %205 = vrot.lane.b32.xlu1 %v204_v62, %s447_s30  ;;  %s452_s30 = smov 28  }
  0x2c   :  { %215 = vrot.lane.b32.xlu0 %v214_v3, %s448_s10  ;;  %225 = vrot.lane.b32.xlu1 %v224_v4, %s449_s11  ;;  %s454_s11 = smov 20  }
  0x30   :  { %235 = vrot.lane.b32.xlu0 %v234_v9, %s450_s20  ;;  %245 = vrot.lane.b32.xlu1 %v244_v10, %s451_s21 }
  0x34   :  { %255 = vrot.lane.b32.xlu0 %v254_v15, %s452_s30  ;;  %265 = vrot.lane.b32.xlu1 %v264_v16, %s453_s2 }
  0x38   :  { %275 = vrot.lane.b32.xlu0 %v274_v21, %s454_s11  ;;  %285 = vrot.lane.b32.xlu1 %v284_v22, %s455_s12 }
  0x3c   :  { %295 = vrot.lane.b32.xlu0 %v294_v27, %s456_s0  ;;  %305 = vrot.lane.b32.xlu1 %v304_v28, %s457_s17 }
  0x40   :  { %315 = vrot.lane.b32.xlu0 %v314_v31, %s458_s18 }
  0x76   :  { %v16_v32 = vpop.permute.xlu0 %15   ;;  %v36_v33 = vpop.permute.xlu1 %35  }
  0x77   :  { %18 = vst.msk [vmem:[#allocation0] ss:$8 sm:$0x3] %vm17_vm2, %v16_v32   ;;  %vm177_vm2 = vcmask 523744  }
  0x7a   :  { %v26_v34 = vpop.permute.xlu0 %25   ;;  %v46_v35 = vpop.permute.xlu1 %45  }
  0x7b   :  { %28 = vst.msk [vmem:[#allocation0] ss:$8 sm:$0x3] %vm27_vm3, %v26_v34   ;;  %vm187_vm3 = vcmask 490944  }
  0x7c   :  { %38 = vst.msk [vmem:[#allocation0] ss:$8 sm:$0x3] %vm37_vm4, %v36_v33   ;;  %vm197_vm4 = vcmask 458144  }
  0x7d   :  { %48 = vst.msk [vmem:[#allocation0] ss:$8 sm:$0x3] %vm47_vm5, %v46_v35   ;;  %vm207_vm5 = vcmask 425344  }
  0x7e   :  { %v56_v36 = vpop.permute.xlu0 %55   ;;  %v66_v37 = vpop.permute.xlu1 %65  }
  0x7f   :  { %58 = vst.msk [vmem:[#allocation0] ss:$8 sm:$0x3] %vm57_vm6, %v56_v36   ;;  %vm217_vm6 = vcmask 392544  }
  0x80   :  { %68 = vst.msk [vmem:[#allocation0] ss:$8 sm:$0x3] %vm67_vm7, %v66_v37   ;;  %vm227_vm7 = vcmask 359744  }
  0x82   :  { %v76_v38 = vpop.permute.xlu0 %75   ;;  %v86_v39 = vpop.permute.xlu1 %85  }
  0x83   :  { %78 = vst.msk [vmem:[#allocation0] ss:$8 sm:$0x3] %vm77_vm8, %v76_v38   ;;  %vm237_vm8 = vcmask 326944  }
  0x84   :  { %88 = vst.msk [vmem:[#allocation0] ss:$8 sm:$0x3] %vm87_vm9, %v86_v39   ;;  %vm247_vm9 = vcmask 294144  }
  0x86   :  { %v96_v40 = vpop.permute.xlu0 %95   ;;  %v106_v41 = vpop.permute.xlu1 %105  }
  0x87   :  { %98 = vst.msk [vmem:[#allocation0] ss:$8 sm:$0x3] %vm97_vm10, %v96_v40   ;;  %vm257_vm10 = vcmask 261344  }
  0x88   :  { %108 = vst.msk [vmem:[#allocation0] ss:$8 sm:$0x3] %vm107_vm11, %v106_v41   ;;  %vm267_vm11 = vcmask 228544  }
  0x8a   :  { %v116_v42 = vpop.permute.xlu0 %115   ;;  %v126_v43 = vpop.permute.xlu1 %125  }
  0x8b   :  { %118 = vst.msk [vmem:[#allocation0] ss:$8 sm:$0x3] %vm117_vm12, %v116_v42   ;;  %vm277_vm12 = vcmask 195744  }
  0x8c   :  { %128 = vst.msk [vmem:[#allocation0] ss:$8 sm:$0x3] %vm127_vm13, %v126_v43   ;;  %vm287_vm13 = vcmask 162944  }
  0x8e   :  { %v136_v44 = vpop.permute.xlu0 %135   ;;  %v146_v45 = vpop.permute.xlu1 %145  }
  0x8f   :  { %138 = vst.msk [vmem:[#allocation0] ss:$8 sm:$0x3] %vm137_vm14, %v136_v44   ;;  %vm297_vm14 = vcmask 130144  }
  0x90   :  { %148 = vst.msk [vmem:[#allocation0] ss:$8 sm:$0x3] %vm147_vm15, %v146_v45   ;;  %vm307_vm15 = vcmask 97344  }
  0x92   :  { %v156_v46 = vpop.permute.xlu0 %155   ;;  %v166_v47 = vpop.permute.xlu1 %165  }
  0x93   :  { %158 = vst.msk [vmem:[#allocation0] ss:$8 sm:$0x3] %vm157_vm0, %v156_v46   ;;  %vm317_vm0 = vcmask 64544  }
  0x94   :  { %168 = vst.msk [vmem:[#allocation0] ss:$8 sm:$0x3] %vm167_vm1, %v166_v47  }
  0x96   :  { %v176_v48 = vpop.permute.xlu0 %175   ;;  %v186_v49 = vpop.permute.xlu1 %185  }
  0x97   :  { %178 = vst.msk [vmem:[#allocation0] ss:$8 sm:$0x3] %vm177_vm2, %v176_v48  }
  0x98   :  { %188 = vst.msk [vmem:[#allocation0] ss:$8 sm:$0x3] %vm187_vm3, %v186_v49  }
  0x9a   :  { %v196_v50 = vpop.permute.xlu0 %195   ;;  %v206_v51 = vpop.permute.xlu1 %205  }
  0x9b   :  { %198 = vst.msk [vmem:[#allocation0] ss:$8 sm:$0x3] %vm197_vm4, %v196_v50  }
  0x9c   :  { %208 = vst.msk [vmem:[#allocation0] ss:$8 sm:$0x3] %vm207_vm5, %v206_v51  }
  0x9e   :  { %v216_v52 = vpop.permute.xlu0 %215   ;;  %v226_v53 = vpop.permute.xlu1 %225  }
  0x9f   :  { %218 = vst.msk [vmem:[#allocation0] ss:$8 sm:$0x3] %vm217_vm6, %v216_v52  }
  0xa0   :  { %228 = vst.msk [vmem:[#allocation0] ss:$8 sm:$0x3] %vm227_vm7, %v226_v53  }
  0xa2   :  { %v236_v54 = vpop.permute.xlu0 %235   ;;  %v246_v55 = vpop.permute.xlu1 %245  }
  0xa3   :  { %238 = vst.msk [vmem:[#allocation0] ss:$8 sm:$0x3] %vm237_vm8, %v236_v54  }
  0xa4   :  { %248 = vst.msk [vmem:[#allocation0] ss:$8 sm:$0x3] %vm247_vm9, %v246_v55  }
  0xa6   :  { %v256_v56 = vpop.permute.xlu0 %255   ;;  %v266_v57 = vpop.permute.xlu1 %265  }
  0xa7   :  { %258 = vst.msk [vmem:[#allocation0] ss:$8 sm:$0x3] %vm257_vm10, %v256_v56  }
  0xa8   :  { %268 = vst.msk [vmem:[#allocation0] ss:$8 sm:$0x3] %vm267_vm11, %v266_v57  }
  0xaa   :  { %v276_v58 = vpop.permute.xlu0 %275   ;;  %v286_v59 = vpop.permute.xlu1 %285  }
  0xab   :  { %278 = vst.msk [vmem:[#allocation0] ss:$8 sm:$0x3] %vm277_vm12, %v276_v58  }
  0xac   :  { %288 = vst.msk [vmem:[#allocation0] ss:$8 sm:$0x3] %vm287_vm13, %v286_v59  }
  0xae   :  { %v296_v60 = vpop.permute.xlu0 %295   ;;  %v306_v61 = vpop.permute.xlu1 %305  }
  0xaf   :  { %298 = vst.msk [vmem:[#allocation0] ss:$8 sm:$0x3] %vm297_vm14, %v296_v60  }
  0xb0   :  { %308 = vst.msk [vmem:[#allocation0] ss:$8 sm:$0x3] %vm307_vm15, %v306_v61  }
  0xb2   :  { %v316_v62 = vpop.permute.xlu0 %315  }
  0xb3   :  { %318 = vst.msk [vmem:[#allocation0] ss:$8 sm:$0x3] %vm317_vm0, %v316_v62  }
  0xba   :  { %v323_v63 = vld [vmem:[#allocation0] sm:$0x1]  ;;  %v328_v0 = vld [vmem:[#allocation0 + $0x8] sm:$0x1] }
  0xbb   :  { %326 = vst [vmem:[%s700_s1] sm:$0x1] %v323_v63  ;;  %396 = vst [vmem:[%s700_s1 + $0x1] sm:$0x1] %v328_v0 }

// kernel: simpleblockexpand_forward.1
= control target key start
LH: loop header
LB: loop body
LE: loop exit
PB: predicated region body
PF: predicated region fallthrough
CT: control target
= control target key end

     0   :  { %vm52_vm0 = vsmask.f32 3328  ;;  %vm53_vm1 = vsmask.f32 7440  ;;  %vm111_vm2 = vcmask 1042432   ;;  %vm112_vm3 = vcmask 1046532   ;;  %s2567_s1 = inlined_call_operand.vmem [shape: bf16[3,64,128], index: 1, kind: input, shape index: {}]   ;;  %s2568_s0 = inlined_call_operand.vmem [shape: bf16[2,18,64], index: 0, kind: input, shape index: {}]   ;;  %s2569_s5 = inlined_call_operand.vmem [shape: f32[128,8], index: 5, kind: input, shape index: {}]   ;;  %s2570_s6 = inlined_call_operand.vmem [shape: f32[8,128], index: 6, kind: input, shape index: {}]   ;;  %s2571_s2 = inlined_call_operand.vmem [shape: bf16[3,128,128], index: 2, kind: input, shape index: {}]   ;;  %s2572_s3 = inlined_call_operand.vmem [shape: bf16[128,256], index: 3, kind: input, shape index: {}]   ;;  %s2573_s7 = inlined_call_operand.vmem [shape: f32[32,128], index: 7, kind: output, shape index: {0}]   ;;  %s2574_s4 = inlined_call_operand.vmem [shape: f32[1,256], index: 4, kind: input, shape index: {}]   ;;  %s2575_s8 = inlined_call_operand.vmem [shape: f32[32,256], index: 8, kind: output, shape index: {1}]  }
   0x1   :  { %v1890_v0 = vld [vmem:[%s2567_s1 + $0x38] sm:$0xff]   ;;  %v1891_v1 = vld [vmem:[%s2567_s1 + $0x30] sm:$0xff]   ;;  %v1892_v2 = vld [vmem:[%s2567_s1 + $0x28] sm:$0xff]   ;;  %vm175_vm4 = vcmask 523264   ;;  %vm1959_vm7 = vmmov 0   ;;  %vm535_vm9 = vcmask 64512  }
   0x2   :  { %1711 = vmatprep.subr.bf16.mxu1 %v1890_v0  ;;  %v1894_v3 = vld [vmem:[%s2567_s1 + $0x58] sm:$0xff]   ;;  %v2021_v4 = vld [vmem:[%s2568_s0] sm:$0xf]  ;;  %v2026_v5 = vld [vmem:[%s2568_s0 + $0x4] sm:$0xf]  ;;  %vm631_vm10 = vcmask 1040384  }
   0x3   :  { %1712 = vmatpush3.bf16.msra.mxu1 %v1890_v0  ;;  %v2031_v6 = vld [vmem:[%s2568_s0 + $0x8] sm:$0x1]  ;;  %v1893_v7 = vld [vmem:[%s2567_s1 + $0x20] sm:$0xff]   ;;  %1735 = vmatprep.subr.bf16.mxu0 %v1894_v3  ;;  %v56_v8 = vshrl.u32 %v2021_v4, 16  ;;  %v59_v9 = vshll.u32 %v2021_v4, 16  ;;  %v65_v10 = vshll.u32 %v2026_v5, 16  ;;  %vm2066_vm5 = vmor %vm52_vm0, %vm53_vm1  ;;  %v1513_v59 = vcombine.low %v2021_v4, %v2026_v5 }
   0x4   :  { %1713 = vmatprep.subr.bf16.mxu1 %v1891_v1  ;;  %v69_v11 = vshrl.u32 %v2026_v5, 16  ;;  %v2043_v12 = vld [vmem:[%s2568_s0 + $0xc] sm:$0xf]  ;;  %1736 = vmatpush3.bf16.msra.mxu0 %v1894_v3  ;;  %v75_v13 = vshll.u32 %v2031_v6, 16  ;;  %v2049_v14 = vld [vmem:[%s2568_s0 + $0x10] sm:$0xf]  ;;  %vm2084_vm6 = vmor %vm111_vm2, %vm112_vm3 }
   0x5   :  { %v2054_v15 = vld [vmem:[%s2568_s0 + $0x14] sm:$0x1]  ;;  %v80_v16 = vshrl.u32 %v2043_v12, 16  ;;  %v58_v17 = vrot.slane %v56_v8, 4  ;;  %v61_v18 = vrot.slane %v59_v9, 5  ;;  %v67_v19 = vrot.slane %v65_v10, 5 }
   0x6   :  { %v71_v20 = vrot.slane %v69_v11, 4  ;;  %v77_v21 = vrot.slane %v75_v13, 5  ;;  %v83_v23 = vshll.u32 %v2043_v12, 16  ;;  %v89_v24 = vshll.u32 %v2049_v14, 16  ;;  %v1896_v29 = vld [vmem:[%s2567_s1 + $0x50] sm:$0xff]   ;;  %v1895_v36 = vld [vmem:[%s2567_s1 + $0x18] sm:$0xff]  }
   0x7   :  { %1714 = vmatpush3.bf16.msra.mxu1 %v1891_v1  ;;  %v82_v22 = vrot.slane %v80_v16, 4  ;;  %v62_v25 = vor.u32 %v61_v18, %v58_v17  ;;  %v93_v27 = vshrl.u32 %v2049_v14, 16  ;;  %v99_v28 = vshll.u32 %v2054_v15, 16  ;;  %1737 = vmatprep.subr.bf16.mxu0 %v1896_v29  ;;  %v1898_v43 = vld [vmem:[%s2567_s1 + $0x48] sm:$0xff]   ;;  %v1900_v49 = vld [vmem:[%s2567_s1 + $0x40] sm:$0xff]   ;;  %v1897_v61 = vld [vmem:[%s2567_s1 + $0x10] sm:$0xff]  }
   0x8   :  { %1715 = vmatprep.subr.bf16.mxu1 %v1892_v2  ;;  %v72_v26 = vor.u32 %v71_v20, %v67_v19  ;;  %v85_v31 = vrot.slane %v83_v23, 5  ;;  %v91_v32 = vrot.slane %v89_v24, 5  ;;  %1738 = vmatpush3.bf16.msra.mxu0 %v1896_v29  ;;  %v116_v39 = vrot.slane %v2026_v5, 5  ;;  %v103_v50 = vld [vmem:[%s2568_s0] sm:$0xe]  ;;  %v1899_v5 = vld [vmem:[%s2567_s1 + $0x8] sm:$0xff]  }
   0x9   :  { %v63_v33 = vrot.slane %v62_v25, 4  ;;  %v95_v35 = vrot.slane %v93_v27, 4  ;;  %v101_v38 = vrot.slane %v99_v28, 5  ;;  %v119_v44 = vrot.slane %v2031_v6, 5  ;;  %1739 = vmatprep.subr.bf16.mxu0 %v1898_v43  ;;  %v104_v57 = vld [vmem:[%s2568_s0 + $0xc] sm:$0xe] }
   0xa   :  { %v73_v34 = vrot.slane %v72_v26, 4  ;;  %v86_v37 = vor.u32 %v85_v31, %v82_v22  ;;  %v118_v51 = vrot.slane %v116_v39, 4  ;;  %v1495_v53 = vrot.slane %v103_v50, 9  ;;  %v1901_v6 = vld [vmem:[%s2567_s1] sm:$0xff]   ;;  %v2134_v9 = vld [vmem:[%s2569_s5 + $0x78] sm:$0xff]  ;;  %v2141_v10 = vld [vmem:[%s2569_s5 + $0x70] sm:$0xff] }
   0xb   :  { %1716 = vmatpush3.bf16.msra.mxu1 %v1892_v2  ;;  %v68_v40 = vsel %vm2066_vm5, %v63_v33, %v67_v19  ;;  %v96_v42 = vor.u32 %v95_v35, %v91_v32  ;;  %v123_v54 = vrot.slane %v2049_v14, 5  ;;  %v126_v58 = vrot.slane %v2054_v15, 5  ;;  %v2148_v11 = vld [vmem:[%s2569_s5 + $0x68] sm:$0xff]  ;;  %v2162_v13 = vld [vmem:[%s2569_s5 + $0x58] sm:$0xff]  ;;  %v2183_v16 = vld [vmem:[%s2569_s5 + $0x40] sm:$0xff] }
   0xc   :  { %1717 = vmatprep.subr.bf16.mxu1 %v1893_v7  ;;  %v78_v41 = vsel %vm2066_vm5, %v73_v34, %v77_v21  ;;  %v87_v46 = vrot.slane %v86_v37, 4  ;;  %1740 = vmatpush3.bf16.msra.mxu0 %v1898_v43  ;;  %v120_v56 = vsel %vm2084_vm6, %v118_v51, %v119_v44  ;;  %v117_v62 = vsel %vm2084_vm6, %v1495_v53, %v116_v39  ;;  %v2176_v15 = vld [vmem:[%s2569_s5 + $0x48] sm:$0xff]  ;;  %v2190_v17 = vld [vmem:[%s2569_s5 + $0x38] sm:$0xff]  ;;  %v2196_v18 = vld [vmem:[%s2569_s5 + $0x30] sm:$0xff] }
   0xd   :  { %v1505_v45 = vcombine.low %v68_v40, %v78_v41  ;;  %v97_v48 = vrot.slane %v96_v42, 4  ;;  %1741 = vmatprep.subr.bf16.mxu0 %v1900_v49  ;;  %v1496_v63 = vrot.slane %v104_v57, 9  ;;  %v125_v0 = vrot.slane %v123_v54, 4  ;;  %v2202_v19 = vld [vmem:[%s2569_s5 + $0x28] sm:$0xff]  ;;  %v2211_v20 = vld [vmem:[%s2569_s5 + $0x20] sm:$0xff]  ;;  %v2218_v21 = vld [vmem:[%s2569_s5 + $0x18] sm:$0xff] }
   0xe   :  { %v92_v52 = vsel %vm2066_vm5, %v87_v46, %v91_v32  ;;  %v1529_v1 = vcombine.low %v117_v62, %v120_v56  ;;  %v1958_v8 = vmov 0.0   ;;  %v2225_v22 = vld [vmem:[%s2569_s5 + $0x10] sm:$0xff]  ;;  %v2232_v23 = vld [vmem:[%s2569_s5 + $0x8] sm:$0xff]  ;;  %v2239_v24 = vld [vmem:[%s2569_s5] sm:$0xff]  ;;  %vm632_vm11 = vsmask.f32 256 }
   0xf   :  { %1718 = vmatpush3.bf16.msra.mxu1 %v1893_v7  ;;  %1719 = vmatprep.mubr.msk.bf16.mxu1 %vm175_vm4, %v1505_v45  ;;  %v102_v55 = vsel %vm2066_vm5, %v97_v48, %v101_v38  ;;  %v124_v2 = vsel %vm2084_vm6, %v1496_v63, %v123_v54  ;;  %v127_v3 = vsel %vm2084_vm6, %v125_v0, %v126_v58  ;;  %vm640_vm12 = vsmask.f32 7938  ;;  %vm2326_vm13 = vmand %vm631_vm10, %vm632_vm11 }
  0x10   :  { %1723 = vmatprep.subr.bf16.mxu1 %v1895_v36  ;;  %v1506_v60 = vcombine.low %v92_v52, %v102_v55  ;;  %1742 = vmatpush3.bf16.msra.mxu0 %v1900_v49  ;;  %v1530_v4 = vcombine.low %v124_v2, %v127_v3  ;;  %v1514_v7 = vcombine.low %v2043_v12, %v2049_v14  ;;  %v2155_v12 = vld [vmem:[%s2569_s5 + $0x60] sm:$0xff]  ;;  %v2169_v14 = vld [vmem:[%s2569_s5 + $0x50] sm:$0xff]  ;;  %vm641_vm14 = vmand %vm631_vm10, %vm640_vm12  ;;  %vm658_vm15 = vsmask.f32 4368 }
  0x11   :  { %1743 = vmatprep.mubr.msk.bf16.mxu0 %vm175_vm4, %v1529_v1  ;;  %vm700_vm0 = vcmask 1043456   ;;  %vm2361_vm1 = vmor %vm632_vm11, %vm658_vm15 }
  0x12   :  { %1720 = vmatmul.mubr.msk.bf16.vlgmr.msra.gmra.mxu1 %vm175_vm4, %v1506_v60  ;;  %vm2366_vm2 = vmand %vm700_vm0, %vm640_vm12 }
  0x13   :  { %1724 = vmatpush3.bf16.msra.mxu1 %v1895_v36  ;;  %1731 = vmatprep.mubr.msk.bf16.mxu1 %vm175_vm4, %v1513_v59  ;;  %v438_v59 = vlaneseq }
  0x14   :  { %1725 = vmatprep.subr.bf16.mxu1 %v1897_v61  ;;  %1744 = vmatmul.mubr.msk.bf16.vlgmr.msra.gmra.mxu0 %vm175_vm4, %v1530_v4 }
  0x15   :  { %v2265_v0 = vshrl.u32 %v438_v59, 7 }
  0x17   :  { %1726 = vmatpush3.bf16.msra.mxu1 %v1897_v61  ;;  %vm440_vm8 = vcmp.eq.s32.totalorder %v2265_v0, 0 }
  0x18   :  { %1727 = vmatprep.subr.bf16.mxu1 %v1899_v5 }
  0x1b   :  { %1728 = vmatpush3.bf16.msra.mxu1 %v1899_v5 }
  0x1c   :  { %1729 = vmatprep.subr.bf16.mxu1 %v1901_v6 }
  0x1f   :  { %1730 = vmatpush3.bf16.msra.mxu1 %v1901_v6 }
  0x20   :  { %1747 = vmatprep.subr.mxu1 %v1958_v8 }
  0x22   :  { %1732 = vmatmul.mubr.msk.bf16.vlgmr.msra.gmra.mxu1 %vm175_vm4, %v1514_v7  ;;  %v2275_v7 = vld [vmem:[%s2570_s6] sm:$0xff] }
  0x23   :  { %1748 = vmatpush3.msra.mxu1 %v2134_v9  ;;  %1779 = vmatprep.mubr.msk.f32.mxu1 %vm1959_vm7, %v1958_v8 }
  0x24   :  { %1749 = vmatprep.subr.mxu1 %v1958_v8 }
  0x25   :  { %1750 = vmatpush3.msra.mxu1 %v2141_v10 }
  0x26   :  { %1751 = vmatprep.subr.mxu1 %v1958_v8 }
  0x27   :  { %1752 = vmatpush3.msra.mxu1 %v2148_v11 }
  0x28   :  { %1753 = vmatprep.subr.mxu1 %v1958_v8 }
  0x29   :  { %1754 = vmatpush3.msra.mxu1 %v2155_v12 }
  0x2a   :  { %1755 = vmatprep.subr.mxu1 %v1958_v8 }
  0x2b   :  { %1756 = vmatpush3.msra.mxu1 %v2162_v13 }
  0x2c   :  { %1757 = vmatprep.subr.mxu1 %v1958_v8 }
  0x2d   :  { %1758 = vmatpush3.msra.mxu1 %v2169_v14 }
  0x2e   :  { %1759 = vmatprep.subr.mxu1 %v1958_v8 }
  0x2f   :  { %1760 = vmatpush3.msra.mxu1 %v2176_v15 }
  0x30   :  { %1761 = vmatprep.subr.mxu1 %v1958_v8 }
  0x31   :  { %1762 = vmatpush3.msra.mxu1 %v2183_v16 }
  0x32   :  { %1763 = vmatprep.subr.mxu1 %v1958_v8 }
  0x33   :  { %1764 = vmatpush3.msra.mxu1 %v2190_v17 }
  0x34   :  { %1765 = vmatprep.subr.mxu1 %v1958_v8 }
  0x35   :  { %1766 = vmatpush3.msra.mxu1 %v2196_v18 }
  0x36   :  { %1767 = vmatprep.subr.mxu1 %v1958_v8 }
  0x37   :  { %1768 = vmatpush3.msra.mxu1 %v2202_v19 }
  0x38   :  { %1769 = vmatprep.subr.mxu1 %v1958_v8 }
  0x39   :  { %1770 = vmatpush3.msra.mxu1 %v2211_v20 }
  0x3a   :  { %1771 = vmatprep.subr.mxu1 %v1958_v8 }
  0x3b   :  { %1772 = vmatpush3.msra.mxu1 %v2218_v21 }
  0x3c   :  { %1773 = vmatprep.subr.mxu1 %v1958_v8 }
  0x3d   :  { %1774 = vmatpush3.msra.mxu1 %v2225_v22 }
  0x3e   :  { %1775 = vmatprep.subr.mxu1 %v1958_v8 }
  0x3f   :  { %1776 = vmatpush3.msra.mxu1 %v2232_v23 }
  0x40   :  { %1777 = vmatprep.subr.mxu1 %v1958_v8 }
  0x41   :  { %1778 = vmatpush3.msra.mxu1 %v2239_v24 }
  0x42   :  { %1782 = vmatprep.subr.mxu1 %v1958_v8 }
  0xd2   :  { %v1721_v25 = vpop.f32.mrf.mxu1 }
  0xd4   :  { %v216_v26 = vpop.f32.mrf.mxu1  ;;  %v1745_v28 = vpop.f32.mrf.mxu0 }
  0xd6   :  { %v1722_v27 = vpop.f32.mrf.mxu1  ;;  %v397_v30 = vpop.f32.mrf.mxu0 }
  0xd8   :  { %v219_v29 = vpop.f32.mrf.mxu1  ;;  %v1746_v34 = vpop.f32.mrf.mxu0 }
  0xda   :  { %v400_v41 = vpop.f32.mrf.mxu0 }
  0xe2   :  { %v1733_v31 = vpop.f32.mrf.mxu1 }
  0xe3   :  { %v312_v36 = vadd.f32 %v1733_v31, %v1721_v25  ;;  %v1904_v25 = vld [vmem:[%s2571_s2 + $0x78] sm:$0xff]   ;;  %v1910_v31 = vld [vmem:[%s2571_s2 + $0x50] sm:$0xff]  }
  0xe4   :  { %v303_v32 = vpop.f32.mrf.mxu1  ;;  %1787 = vmatprep.subr.bf16.mxu0 %v1904_v25 }
  0xe5   :  { %v304_v33 = vadd.f32 %v303_v32, %v216_v26  ;;  %v2247_v42 = vadd.f32 %v1745_v28, %v312_v36  ;;  %v1905_v26 = vld [vmem:[%s2571_s2 + $0x70] sm:$0xff]   ;;  %1788 = vmatpush3.bf16.msra.mxu0 %v1904_v25  ;;  %v1909_v28 = vld [vmem:[%s2571_s2 + $0x38] sm:$0xff]  }
  0xe6   :  { %v1734_v35 = vpop.f32.mrf.mxu1  ;;  %1789 = vmatprep.subr.bf16.mxu0 %v1905_v26  ;;  %v1919_v25 = vld [vmem:[%s2571_s2 + $0x10] sm:$0xff]  }
  0xe7   :  { %v2245_v38 = vadd.f32 %v397_v30, %v304_v33  ;;  %v315_v39 = vadd.f32 %v1734_v35, %v1722_v27  ;;  %v427_v49 = vmul.f32 %v2247_v42, %v2247_v42  ;;  %v1906_v27 = vld [vmem:[%s2571_s2 + $0x68] sm:$0xff]   ;;  %v1908_v30 = vld [vmem:[%s2571_s2 + $0x58] sm:$0xff]  }
  0xe8   :  { %v306_v37 = vpop.f32.mrf.mxu1 }
  0xe9   :  { %v307_v40 = vadd.f32 %v306_v37, %v219_v29  ;;  %v425_v44 = vmul.f32 %v2245_v38, %v2245_v38  ;;  %v2253_v45 = vadd.f32 %v1746_v34, %v315_v39  ;;  %v1907_v29 = vld [vmem:[%s2571_s2 + $0x60] sm:$0xff]   ;;  %1790 = vmatpush3.bf16.msra.mxu0 %v1905_v26  ;;  %v1921_v26 = vld [vmem:[%s2571_s2 + $0x8] sm:$0xff]  }
  0xea   :  { %1791 = vmatprep.subr.bf16.mxu0 %v1906_v27 }
  0xeb   :  { %v2249_v43 = vadd.f32 %v400_v41, %v307_v40  ;;  %v428_v52 = vmul.f32 %v2253_v45, %v2253_v45 }
  0xed   :  { %v416_v46 = vadd.f32 %v2249_v43, %v2245_v38  ;;  %v426_v48 = vmul.f32 %v2249_v43, %v2249_v43  ;;  %1792 = vmatpush3.bf16.msra.mxu0 %v1906_v27  ;;  %v1923_v27 = vld [vmem:[%s2571_s2] sm:$0xff]  }
  0xee   :  { %1793 = vmatprep.subr.bf16.mxu0 %v1907_v29 }
  0xef   :  { %v417_v50 = vadd.f32 %v416_v46, %v2247_v42  ;;  %v429_v51 = vadd.f32 %v426_v48, %v425_v44  ;;  %v2300_v44 = vsub.s32 1, %v2265_v0  ;;  %v2303_v46 = vsub.s32 0, %v2265_v0  ;;  %v1941_v0 = vld [vmem:[%s2572_s3 + $0x44] ss:$8 sps:$4 sm:$0xff]  }
  0xf1   :  { %v418_v53 = vadd.f32 %v417_v50, %v2253_v45  ;;  %v430_v54 = vadd.f32 %v429_v51, %v427_v49  ;;  %1794 = vmatpush3.bf16.msra.mxu0 %v1907_v29 }
  0xf2   :  { %1795 = vmatprep.subr.bf16.mxu0 %v1908_v30 }
  0xf3   :  { %v419_v55 = vrot.slane %v418_v53, 4  ;;  %v431_v56 = vadd.f32 %v430_v54, %v428_v52  ;;  %v1911_v54 = vld [vmem:[%s2571_s2 + $0x30] sm:$0xff]  }
  0xf5   :  { %v420_v57 = vadd.f32 %v419_v55, %v418_v53  ;;  %v432_v58 = vrot.slane %v431_v56, 4  ;;  %1796 = vmatpush3.bf16.msra.mxu0 %v1908_v30  ;;  %v1912_v55 = vld [vmem:[%s2571_s2 + $0x48] sm:$0xff]  }
  0xf6   :  { %1797 = vmatprep.subr.bf16.mxu0 %v1910_v31 }
  0xf7   :  { %v421_v60 = vrot.slane %v420_v57, 2  ;;  %v433_v61 = vadd.f32 %v432_v58, %v431_v56  ;;  %v1913_v56 = vld [vmem:[%s2571_s2 + $0x28] sm:$0xff]   ;;  %v1915_v58 = vld [vmem:[%s2571_s2 + $0x20] sm:$0xff]  }
  0xf9   :  { %v422_v62 = vadd.f32 %v421_v60, %v420_v57  ;;  %v434_v63 = vrot.slane %v433_v61, 2  ;;  %1798 = vmatpush3.bf16.msra.mxu0 %v1910_v31  ;;  %v1914_v57 = vld [vmem:[%s2571_s2 + $0x40] sm:$0xff]  }
  0xfa   :  { %1799 = vmatprep.subr.bf16.mxu0 %v1912_v55  ;;  %v634_v60 = vld [vmem:[#allocation2] sm:$0x1] }
  0xfb   :  { %v423_v1 = vrot.slane %v422_v62, 1  ;;  %v435_v2 = vadd.f32 %v434_v63, %v433_v61  ;;  %v637_v61 = vld [vmem:[#allocation2 + $0xc] sm:$0x1] }
  0xfc   :  { %v638_v63 = vsel %vm2326_vm13, 0, %v637_v61 }
  0xfd   :  { %v436_v3 = vrot.slane %v435_v2, 1  ;;  %v424_v4 = vadd.f32 %v423_v1, %v422_v62  ;;  %1800 = vmatpush3.bf16.msra.mxu0 %v1912_v55  ;;  %v635_v62 = vsel %vm2326_vm13, 0, %v634_v60  ;;  %v642_v1 = vld [vmem:[#allocation2 + $0x8] sm:$0x1]  ;;  %639 = vst [vmem:[#allocation2 + $0xc] sm:$0x1] %v638_v63 }
  0xfe   :  { %1801 = vmatprep.subr.bf16.mxu0 %v1914_v57  ;;  %636 = vst [vmem:[#allocation2] sm:$0x1] %v635_v62 }
  0xff   :  { %v437_v5 = vadd.f32 %v436_v3, %v435_v2  ;;  %v645_v2 = vld [vmem:[#allocation2 + $0x14] sm:$0x1]  ;;  %v643_v3 = vsel %vm641_vm14, 0, %v642_v1 }
 0x100   :  { %644 = vst [vmem:[#allocation2 + $0x8] sm:$0x1] %v643_v3  ;;  %v1929_v3 = vld [vmem:[%s2571_s2 + $0x80] sm:$0xff]  }
 0x101   :  { %v441_v6 = vsel %vm440_vm8, %v424_v4, %v437_v5  ;;  %1802 = vmatpush3.bf16.msra.mxu0 %v1914_v57  ;;  %v646_v4 = vsel %vm641_vm14, 0, %v645_v2  ;;  %v1916_v5 = vld [vmem:[%s2571_s2 + $0xb8] sm:$0xff]  }
 0x102   :  { %1780 = vmatmul.mubr.f32.vlgmr.msra.gmra.mxu1 %v441_v6  ;;  %647 = vst [vmem:[#allocation2 + $0x14] sm:$0x1] %v646_v4  ;;  %1827 = vmatprep.subr.bf16.mxu0 %v1916_v5  ;;  %v1917_v6 = vld [vmem:[%s2571_s2 + $0x18] sm:$0xff]  }
 0x103   :  { %1784 = vmatprep.mubr.msk.f32.mxu1 %vm1959_vm7, %v1958_v8  ;;  %1783 = vmatpush3.msra.mxu1 %v2275_v7 }
 0x104   :  { %1807 = vmatprep.subr.bf16.mxu1 %v1909_v28 }
 0x107   :  { %v706_v2 = vld [vmem:[#allocation2 + $0x8] sm:$0x1] }
 0x1c2   :  { %v508_v32 = vpop.f32.mrf.mxu1 }
 0x1c3   :  { %v512_v33 = vmul.f32 0.001953125, %v508_v32 }
 0x1c4   :  { %v1781_v34 = vpop.f32.mrf.mxu1 }
 0x1c5   :  { %v513_v35 = vmul.f32 %v512_v33, %v512_v33  ;;  %v521_v48 = vsub.f32 0.0, %v512_v33 }
 0x1c7   :  { %v515_v36 = vrot.slane %v513_v35, 7 }
 0x1c9   :  { %v517_v37 = vsub.f32 %v512_v33, %v515_v36 }
 0x1cb   :  { %v518_v39 = vmax.f32 %v517_v37, 0.0 }
 0x1cd   :  { %v519_v40 = vadd.f32 1e-05, %v518_v39 }
 0x1cf   :  { %1954 = vrsqrt.f32 %v519_v40 }
 0x1dc   :  { %v1955_v41 = vpop.eup %1954 }
 0x1dd   :  { %v523_v49 = vrot.slane %v1955_v41, 1  ;;  %v529_v52 = vrot.slane %v1955_v41, %v2300_v44 }
 0x1df   :  { %v525_v50 = vmul.f32 %v523_v49, %v521_v48 }
 0x1e1   :  { %v533_v51 = vrot.slane %v525_v50, %v2303_v46 }
 0x1e3   :  { %v534_v53 = vsel %vm440_vm8, %v529_v52, %v533_v51 }
 0x1e4   :  { %1785 = vmatmul.mubr.msk.f32.vlgmr.msra.gmra.mxu1 %vm535_vm9, %v534_v53 }
 0x1e5   :  { %1808 = vmatpush3.bf16.msra.mxu1 %v1909_v28 }
 0x1e6   :  { %1809 = vmatprep.subr.bf16.mxu1 %v1911_v54 }
 0x1e9   :  { %1810 = vmatpush3.bf16.msra.mxu1 %v1911_v54 }
 0x1ea   :  { %1811 = vmatprep.subr.bf16.mxu1 %v1913_v56 }
 0x1ed   :  { %1812 = vmatpush3.bf16.msra.mxu1 %v1913_v56  ;;  %v702_v56 = vld [vmem:[#allocation2] sm:$0xf] }
 0x1ee   :  { %1813 = vmatprep.subr.bf16.mxu1 %v1915_v58 }
 0x1f1   :  { %1814 = vmatpush3.bf16.msra.mxu1 %v1915_v58 }
 0x1f2   :  { %1815 = vmatprep.subr.bf16.mxu1 %v1917_v6 }
 0x1f5   :  { %1816 = vmatpush3.bf16.msra.mxu1 %v1917_v6 }
 0x1f6   :  { %1817 = vmatprep.subr.bf16.mxu1 %v1919_v25 }
 0x1f9   :  { %1818 = vmatpush3.bf16.msra.mxu1 %v1919_v25 }
 0x1fa   :  { %1819 = vmatprep.subr.bf16.mxu1 %v1921_v26 }
 0x1fd   :  { %1820 = vmatpush3.bf16.msra.mxu1 %v1921_v26 }
 0x1fe   :  { %1821 = vmatprep.subr.bf16.mxu1 %v1923_v27 }
 0x201   :  { %1822 = vmatpush3.bf16.msra.mxu1 %v1923_v27  ;;  %v1920_v27 = vld [vmem:[%s2571_s2 + $0xa8] sm:$0xff]  }
 0x202   :  { %1847 = vmatprep.subr.mxu1 %v1958_v8 }
 0x2a4   :  { %v605_v28 = vpop.f32.mrf.mxu1 }
 0x2a5   :  { %v612_v29 = vrot.slane %v605_v28, %v2303_v46  ;;  %v620_v30 = vrot.slane %v605_v28, %v2300_v44 }
 0x2a6   :  { %v1786_v31 = vpop.f32.mrf.mxu1 }
 0x2a7   :  { %v615_v32 = vmul.f32 %v612_v29, %v2247_v42  ;;  %v616_v33 = vmul.f32 %v612_v29, %v2253_v45  ;;  %v613_v34 = vmul.f32 %v612_v29, %v2245_v38  ;;  %v614_v35 = vmul.f32 %v612_v29, %v2249_v43  ;;  %v1918_v38 = vld [vmem:[%s2571_s2 + $0xb0] sm:$0xff]  }
 0x2a9   :  { %v623_v36 = vadd.f32 %v620_v30, %v615_v32  ;;  %v624_v37 = vadd.f32 %v620_v30, %v616_v33  ;;  %v621_v39 = vadd.f32 %v620_v30, %v613_v34  ;;  %v622_v40 = vadd.f32 %v620_v30, %v614_v35  ;;  %v709_v32 = vld [vmem:[#allocation2 + $0xc] sm:$0xf] }
 0x2ab   :  { %v625_v41 = vmax.f32 %v621_v39, 0.0  ;;  %v626_v48 = vmax.f32 %v622_v40, 0.0  ;;  %v627_v49 = vmax.f32 %v623_v36, 0.0  ;;  %v628_v50 = vmax.f32 %v624_v37, 0.0 }
 0x2ad   :  { %v629_v51 = vpack.c.bf16 %v626_v48, %v625_v41  ;;  %v1621_v52 = vpack.c.bf16 %v625_v41, %v625_v41  ;;  %v1622_v53 = vpack.c.bf16 %v626_v48, %v626_v48  ;;  %v630_v54 = vpack.c.bf16 %v628_v50, %v627_v49 }
 0x2ae   :  { %v1623_v42 = vpack.c.bf16 %v627_v49, %v627_v49  ;;  %v1624_v55 = vpack.c.bf16 %v628_v50, %v628_v50  ;;  %v1922_v50 = vld [vmem:[%s2571_s2 + $0xa0] sm:$0xff]  }
 0x2af   :  { %v661_v43 = vshrl.u32 %v1621_v52, 16  ;;  %v669_v45 = vshrl.u32 %v1622_v53, 16  ;;  %1803 = vmatprep.mubr.bf16.mxu0 %v629_v51  ;;  %v664_v62 = vshll.u32 %v1621_v52, 16  ;;  %v672_v1 = vshll.u32 %v1622_v53, 16  ;;  %v1924_v51 = vld [vmem:[%s2571_s2 + $0x98] sm:$0xff]   ;;  %v1927_v52 = vld [vmem:[%s2571_s2 + $0x90] sm:$0xff]  }
 0x2b0   :  { %v678_v57 = vshrl.u32 %v1623_v42, 16  ;;  %v686_v58 = vshrl.u32 %v1624_v55, 16  ;;  %1804 = vmatmul.mubr.bf16.vlgmr.msra.gmra.mxu0 %v630_v54  ;;  %v681_v6 = vshll.u32 %v1623_v42, 16  ;;  %v689_v26 = vshll.u32 %v1624_v55, 16 }
 0x2b1   :  { %v663_v61 = vrot.slane %v661_v43, 7  ;;  %v671_v63 = vrot.slane %v669_v45, 7  ;;  %1828 = vmatpush3.bf16.msra.mxu0 %v1916_v5  ;;  %v713_v5 = vld [vmem:[#allocation2 + $0x14] sm:$0x1] }
 0x2b2   :  { %v680_v4 = vrot.slane %v678_v57, 7  ;;  %v688_v25 = vrot.slane %v686_v58, 7  ;;  %1829 = vmatprep.subr.bf16.mxu0 %v1918_v38 }
 0x2b3   :  { %v666_v28 = vor.u32 %v664_v62, %v663_v61  ;;  %v667_v29 = vrot.slane %v663_v61, 4  ;;  %v674_v30 = vor.u32 %v672_v1, %v671_v63  ;;  %v676_v31 = vrot.slane %v671_v63, 4  ;;  %v1928_v63 = vld [vmem:[%s2571_s2 + $0x88] sm:$0xff]  }
 0x2b4   :  { %v683_v33 = vor.u32 %v681_v6, %v680_v4  ;;  %v684_v34 = vrot.slane %v680_v4, 4  ;;  %v691_v35 = vor.u32 %v689_v26, %v688_v25  ;;  %v693_v36 = vrot.slane %v688_v25, 4 }
 0x2b5   :  { %v675_v37 = vsel %vm2361_vm1, %v667_v29, %v674_v30  ;;  %v703_v39 = vsel %vm2366_vm2, %v666_v28, %v702_v56  ;;  %v707_v40 = vsel %vm2326_vm13, %v676_v31, %v706_v2  ;;  %1830 = vmatpush3.bf16.msra.mxu0 %v1918_v38 }
 0x2b6   :  { %704 = vst [vmem:[#allocation2] sm:$0xf] %v703_v39  ;;  %705 = vst [vmem:[#allocation2 + $0x4] sm:$0xf] %v675_v37  ;;  %v692_v41 = vsel %vm2361_vm1, %v684_v34, %v691_v35  ;;  %v710_v48 = vsel %vm2366_vm2, %v683_v33, %v709_v32  ;;  %v714_v49 = vsel %vm2326_vm13, %v693_v36, %v713_v5  ;;  %1831 = vmatprep.subr.bf16.mxu0 %v1920_v27 }
 0x2b7   :  { %708 = vst [vmem:[#allocation2 + $0x8] sm:$0x1] %v707_v40  ;;  %711 = vst [vmem:[#allocation2 + $0xc] sm:$0xf] %v710_v48 }
 0x2b8   :  { %712 = vst [vmem:[#allocation2 + $0x10] sm:$0xf] %v692_v41  ;;  %715 = vst [vmem:[#allocation2 + $0x14] sm:$0x1] %v714_v49 }
 0x2b9   :  { %1832 = vmatpush3.bf16.msra.mxu0 %v1920_v27 }
 0x2ba   :  { %1833 = vmatprep.subr.bf16.mxu0 %v1922_v50 }
 0x2bd   :  { %1834 = vmatpush3.bf16.msra.mxu0 %v1922_v50  ;;  %v716_v59 = vld [vmem:[#allocation2] sm:$0xf]  ;;  %v717_v53 = vld [vmem:[#allocation2 + $0x4] sm:$0xf] }
 0x2be   :  { %v720_v54 = vld [vmem:[#allocation2] sm:$0xe]  ;;  %1835 = vmatprep.subr.bf16.mxu0 %v1924_v51  ;;  %v732_v42 = vrot.slane %v717_v53, 5  ;;  %v1568_v55 = vcombine.low %v716_v59, %v717_v53  ;;  %v718_v38 = vld [vmem:[#allocation2 + $0xc] sm:$0xf] }
 0x2bf   :  { %v719_v43 = vld [vmem:[#allocation2 + $0x10] sm:$0xf]  ;;  %v1542_v45 = vrot.slane %v720_v54, 9  ;;  %v721_v57 = vld [vmem:[#allocation2 + $0x8] sm:$0x1] }
 0x2c0   :  { %v1569_v56 = vcombine.low %v718_v38, %v719_v43  ;;  %v734_v58 = vrot.slane %v732_v42, 4  ;;  %1823 = vmatprep.mubr.bf16.mxu1 %v1568_v55  ;;  %v735_v60 = vrot.slane %v721_v57, 5  ;;  %v739_v1 = vrot.slane %v719_v43, 5  ;;  %v722_v4 = vld [vmem:[#allocation2 + $0xc] sm:$0xe] }
 0x2c1   :  { %1836 = vmatpush3.bf16.msra.mxu0 %v1924_v51  ;;  %v733_v61 = vsel %vm2084_vm6, %v1542_v45, %v732_v42  ;;  %v723_v6 = vld [vmem:[#allocation2 + $0x14] sm:$0x1]  ;;  %v1543_v25 = vrot.slane %v722_v4, 9 }
 0x2c2   :  { %1824 = vmatmul.mubr.bf16.vlgmr.msra.gmra.mxu1 %v1569_v56  ;;  %1837 = vmatprep.subr.bf16.mxu0 %v1927_v52  ;;  %v736_v62 = vsel %vm2084_vm6, %v734_v58, %v735_v60  ;;  %v742_v26 = vrot.slane %v723_v6, 5  ;;  %v1932_v56 = vld [vmem:[%s2572_s3 + $0x74] ss:$8 sps:$4 sm:$0xff]  }
 0x2c3   :  { %1848 = vmatpush3.msra.mxu1 %v2134_v9  ;;  %v1594_v2 = vcombine.low %v733_v61, %v736_v62  ;;  %1879 = vmatprep.mubr.msk.f32.mxu1 %vm1959_vm7, %v1958_v8  ;;  %v741_v9 = vrot.slane %v739_v1, 4 }
 0x2c4   :  { %1849 = vmatprep.subr.mxu1 %v1958_v8 }
 0x2c5   :  { %1850 = vmatpush3.msra.mxu1 %v2141_v10  ;;  %1838 = vmatpush3.bf16.msra.mxu0 %v1927_v52  ;;  %v743_v10 = vsel %vm2084_vm6, %v741_v9, %v742_v26 }
 0x2c6   :  { %1843 = vmatprep.mubr.bf16.mxu0 %v1594_v2  ;;  %1839 = vmatprep.subr.bf16.mxu0 %v1928_v63 }
 0x2c7   :  { %1851 = vmatprep.subr.mxu1 %v1958_v8 }
 0x2c8   :  { %1852 = vmatpush3.msra.mxu1 %v2148_v11  ;;  %v740_v11 = vsel %vm2084_vm6, %v1543_v25, %v739_v1 }
 0x2c9   :  { %1853 = vmatprep.subr.mxu1 %v1958_v8  ;;  %1840 = vmatpush3.bf16.msra.mxu0 %v1928_v63  ;;  %v1595_v27 = vcombine.low %v740_v11, %v743_v10  ;;  %v1930_v10 = vld [vmem:[%s2572_s3 + $0x70] ss:$8 sps:$4 sm:$0xff]   ;;  %v1935_v11 = vld [vmem:[%s2572_s3 + $0x64] ss:$8 sps:$4 sm:$0xff]  }
 0x2ca   :  { %1854 = vmatpush3.msra.mxu1 %v2155_v12  ;;  %1841 = vmatprep.subr.bf16.mxu0 %v1929_v3 }
 0x2cb   :  { %1855 = vmatprep.subr.mxu1 %v1958_v8 }
 0x2cc   :  { %1856 = vmatpush3.msra.mxu1 %v2162_v13 }
 0x2cd   :  { %1857 = vmatprep.subr.mxu1 %v1958_v8  ;;  %1842 = vmatpush3.bf16.msra.mxu0 %v1929_v3 }
 0x2ce   :  { %1858 = vmatpush3.msra.mxu1 %v2169_v14  ;;  %1882 = vmatprep.subr.mxu0 %v1958_v8 }
 0x2cf   :  { %1859 = vmatprep.subr.mxu1 %v1958_v8 }
 0x2d0   :  { %1860 = vmatpush3.msra.mxu1 %v2176_v15  ;;  %1844 = vmatmul.mubr.bf16.vlgmr.msra.gmra.mxu0 %v1595_v27 }
 0x2d1   :  { %1861 = vmatprep.subr.mxu1 %v1958_v8  ;;  %1883 = vmatpush3.msra.mxu0 %v2275_v7 }
 0x2d2   :  { %1862 = vmatpush3.msra.mxu1 %v2183_v16  ;;  %1884 = vmatprep.mubr.msk.f32.mxu0 %vm1959_vm7, %v1958_v8 }
 0x2d3   :  { %1863 = vmatprep.subr.mxu1 %v1958_v8  ;;  %1426 = vmatprep.subr.bf16.mxu0 %v1932_v56 }
 0x2d4   :  { %1864 = vmatpush3.msra.mxu1 %v2190_v17 }
 0x2d5   :  { %1865 = vmatprep.subr.mxu1 %v1958_v8 }
 0x2d6   :  { %1866 = vmatpush3.msra.mxu1 %v2196_v18 }
 0x2d7   :  { %1867 = vmatprep.subr.mxu1 %v1958_v8 }
 0x2d8   :  { %1868 = vmatpush3.msra.mxu1 %v2202_v19 }
 0x2d9   :  { %1869 = vmatprep.subr.mxu1 %v1958_v8 }
 0x2da   :  { %1870 = vmatpush3.msra.mxu1 %v2211_v20 }
 0x2db   :  { %1871 = vmatprep.subr.mxu1 %v1958_v8 }
 0x2dc   :  { %1872 = vmatpush3.msra.mxu1 %v2218_v21 }
 0x2dd   :  { %1873 = vmatprep.subr.mxu1 %v1958_v8 }
 0x2de   :  { %1874 = vmatpush3.msra.mxu1 %v2225_v22 }
 0x2df   :  { %1875 = vmatprep.subr.mxu1 %v1958_v8 }
 0x2e0   :  { %1876 = vmatpush3.msra.mxu1 %v2232_v23 }
 0x2e1   :  { %1877 = vmatprep.subr.mxu1 %v1958_v8 }
 0x2e2   :  { %1878 = vmatpush3.msra.mxu1 %v2239_v24 }
 0x370   :  { %v1805_v47 = vpop.f32.mrf.mxu0 }
 0x372   :  { %v859_v12 = vpop.f32.mrf.mxu0 }
 0x374   :  { %v1806_v14 = vpop.f32.mrf.mxu0 }
 0x376   :  { %v862_v16 = vpop.f32.mrf.mxu0 }
 0x382   :  { %v1825_v13 = vpop.f32.mrf.mxu1 }
 0x383   :  { %v975_v7 = vadd.f32 %v1825_v13, %v1805_v47  ;;  %v1933_v47 = vld [vmem:[%s2572_s3 + $0x60] ss:$8 sps:$4 sm:$0xff]   ;;  %v1936_v13 = vld [vmem:[%s2572_s3 + $0x50] ss:$8 sps:$4 sm:$0xff]  }
 0x384   :  { %v966_v15 = vpop.f32.mrf.mxu1 }
 0x385   :  { %v967_v21 = vadd.f32 %v966_v15, %v859_v12  ;;  %v1938_v12 = vld [vmem:[%s2572_s3 + $0x54] ss:$8 sps:$4 sm:$0xff]  }
 0x386   :  { %v1826_v17 = vpop.f32.mrf.mxu1  ;;  %v1944_v15 = vld [vmem:[%s2572_s3 + $0x34] ss:$8 sps:$4 sm:$0xff]  }
 0x387   :  { %v978_v8 = vadd.f32 %v1826_v17, %v1806_v14  ;;  %v1939_v14 = vld [vmem:[%s2572_s3 + $0x40] ss:$8 sps:$4 sm:$0xff]   ;;  %v1947_v17 = vld [vmem:[%s2572_s3 + $0x24] ss:$8 sps:$4 sm:$0xff]  }
 0x388   :  { %v969_v19 = vpop.f32.mrf.mxu1 }
 0x389   :  { %v970_v28 = vadd.f32 %v969_v19, %v862_v16  ;;  %v1942_v16 = vld [vmem:[%s2572_s3 + $0x30] ss:$8 sps:$4 sm:$0xff]   ;;  %v1950_v19 = vld [vmem:[%s2572_s3 + $0x14] ss:$8 sps:$4 sm:$0xff]  }
 0x390   :  { %v1845_v18 = vpop.f32.mrf.mxu0 }
 0x391   :  { %v2447_v30 = vadd.f32 %v1845_v18, %v975_v7  ;;  %v1945_v18 = vld [vmem:[%s2572_s3 + $0x20] ss:$8 sps:$4 sm:$0xff]   ;;  %v1960_v7 = vmov 0  }
 0x392   :  { %v1088_v20 = vpop.f32.mrf.mxu0 }
 0x393   :  { %v2445_v29 = vadd.f32 %v1088_v20, %v967_v21  ;;  %v1118_v34 = vmul.f32 %v2447_v30, %v2447_v30  ;;  %v1948_v20 = vld [vmem:[%s2572_s3 + $0x10] ss:$8 sps:$4 sm:$0xff]   ;;  %v1953_v21 = vld [vmem:[%s2572_s3 + $0x4] ss:$8 sps:$4 sm:$0xff]  }
 0x394   :  { %v1846_v22 = vpop.f32.mrf.mxu0 }
 0x395   :  { %v1116_v31 = vmul.f32 %v2445_v29, %v2445_v29  ;;  %v2453_v32 = vadd.f32 %v1846_v22, %v978_v8  ;;  %v1951_v22 = vld [vmem:[%s2572_s3] ss:$8 sps:$4 sm:$0xff]  }
 0x396   :  { %v1091_v23 = vpop.f32.mrf.mxu0 }
 0x397   :  { %v2449_v24 = vadd.f32 %v1091_v23, %v970_v28  ;;  %v1119_v37 = vmul.f32 %v2453_v32, %v2453_v32 }
 0x399   :  { %v1107_v5 = vadd.f32 %v2449_v24, %v2445_v29  ;;  %v1117_v33 = vmul.f32 %v2449_v24, %v2449_v24 }
 0x39b   :  { %v1108_v35 = vadd.f32 %v1107_v5, %v2447_v30  ;;  %v1120_v36 = vadd.f32 %v1117_v33, %v1116_v31 }
 0x39d   :  { %v1109_v39 = vadd.f32 %v1108_v35, %v2453_v32  ;;  %v1121_v40 = vadd.f32 %v1120_v36, %v1118_v34 }
 0x39f   :  { %v1110_v41 = vrot.slane %v1109_v39, 4  ;;  %v1122_v48 = vadd.f32 %v1121_v40, %v1119_v37 }
 0x3a1   :  { %v1111_v49 = vadd.f32 %v1110_v41, %v1109_v39  ;;  %v1123_v50 = vrot.slane %v1122_v48, 4 }
 0x3a3   :  { %v1112_v51 = vrot.slane %v1111_v49, 2  ;;  %v1124_v52 = vadd.f32 %v1123_v50, %v1122_v48 }
 0x3a5   :  { %v1113_v59 = vadd.f32 %v1112_v51, %v1111_v49  ;;  %v1125_v53 = vrot.slane %v1124_v52, 2 }
 0x3a7   :  { %v1114_v54 = vrot.slane %v1113_v59, 1  ;;  %v1126_v42 = vadd.f32 %v1125_v53, %v1124_v52 }
 0x3a9   :  { %v1127_v55 = vrot.slane %v1126_v42, 1  ;;  %v1115_v38 = vadd.f32 %v1114_v54, %v1113_v59 }
 0x3ab   :  { %v1128_v43 = vadd.f32 %v1127_v55, %v1126_v42 }
 0x3ad   :  { %v1129_v45 = vsel %vm440_vm8, %v1115_v38, %v1128_v43 }
 0x3ae   :  { %1880 = vmatmul.mubr.f32.vlgmr.msra.gmra.mxu1 %v1129_v45 }
 0x46e   :  { %v1196_v57 = vpop.f32.mrf.mxu1 }
 0x46f   :  { %v1200_v58 = vmul.f32 0.001953125, %v1196_v57 }
 0x470   :  { %v1881_v60 = vpop.f32.mrf.mxu1 }
 0x471   :  { %v1201_v61 = vmul.f32 %v1200_v58, %v1200_v58  ;;  %v1209_v4 = vsub.f32 0.0, %v1200_v58 }
 0x473   :  { %v1203_v62 = vrot.slane %v1201_v61, 7 }
 0x475   :  { %v1205_v63 = vsub.f32 %v1200_v58, %v1203_v62 }
 0x477   :  { %v1206_v1 = vmax.f32 %v1205_v63, 0.0 }
 0x479   :  { %v1207_v2 = vadd.f32 1e-05, %v1206_v1 }
 0x47b   :  { %1956 = vrsqrt.f32 %v1207_v2 }
 0x488   :  { %v1957_v3 = vpop.eup %1956 }
 0x489   :  { %v1211_v6 = vrot.slane %v1957_v3, 1  ;;  %v1217_v26 = vrot.slane %v1957_v3, %v2300_v44 }
 0x48b   :  { %v1213_v9 = vmul.f32 %v1211_v6, %v1209_v4 }
 0x48d   :  { %v1221_v25 = vrot.slane %v1213_v9, %v2303_v46 }
 0x48f   :  { %v1222_v27 = vsel %vm440_vm8, %v1217_v26, %v1221_v25 }
 0x490   :  { %1885 = vmatmul.mubr.msk.f32.vlgmr.msra.gmra.mxu0 %vm535_vm9, %v1222_v27 }
 0x491   :  { %1427 = vmatpush1.bf16.msra.mxu0 %v1930_v10  ;;  %1458 = vmatprep.mubr.bf16.mxu0 %v1960_v7 }
 0x492   :  { %1428 = vmatprep.subr.bf16.mxu0 %v1935_v11 }
 0x495   :  { %1429 = vmatpush1.bf16.msra.mxu0 %v1933_v47 }
 0x496   :  { %1430 = vmatprep.subr.bf16.mxu0 %v1938_v12 }
 0x499   :  { %1431 = vmatpush1.bf16.msra.mxu0 %v1936_v13 }
 0x49a   :  { %1432 = vmatprep.subr.bf16.mxu0 %v1941_v0 }
 0x49d   :  { %1433 = vmatpush1.bf16.msra.mxu0 %v1939_v14 }
 0x49e   :  { %1434 = vmatprep.subr.bf16.mxu0 %v1944_v15 }
 0x4a1   :  { %1435 = vmatpush1.bf16.msra.mxu0 %v1942_v16 }
 0x4a2   :  { %1436 = vmatprep.subr.bf16.mxu0 %v1947_v17 }
 0x4a5   :  { %1437 = vmatpush1.bf16.msra.mxu0 %v1945_v18 }
 0x4a6   :  { %1438 = vmatprep.subr.bf16.mxu0 %v1950_v19 }
 0x4a9   :  { %1439 = vmatpush1.bf16.msra.mxu0 %v1948_v20 }
 0x4aa   :  { %1440 = vmatprep.subr.bf16.mxu0 %v1953_v21 }
 0x4ad   :  { %1441 = vmatpush1.bf16.msra.mxu0 %v1951_v22 }
 0x550   :  { %v1292_v28 = vpop.f32.mrf.mxu0 }
 0x551   :  { %v1299_v23 = vrot.slane %v1292_v28, %v2303_v46  ;;  %v1307_v8 = vrot.slane %v1292_v28, %v2300_v44 }
 0x552   :  { %v1886_v31 = vpop.f32.mrf.mxu0 }
 0x553   :  { %v1300_v5 = vmul.f32 %v1299_v23, %v2445_v29  ;;  %v1301_v33 = vmul.f32 %v1299_v23, %v2449_v24  ;;  %v1302_v34 = vmul.f32 %v1299_v23, %v2447_v30  ;;  %v1303_v35 = vmul.f32 %v1299_v23, %v2453_v32  ;;  %v1334_v30 = vld [vmem:[%s2574_s4] sm:$0x3] }
 0x554   :  { %v1339_v24 = vrot.slane %v1334_v30, %v2303_v46  ;;  %v1343_v32 = vrot.slane %v1334_v30, %v2300_v44 }
 0x555   :  { %v1308_v36 = vadd.f32 %v1307_v8, %v1300_v5  ;;  %v1309_v37 = vadd.f32 %v1307_v8, %v1301_v33  ;;  %v1310_v39 = vadd.f32 %v1307_v8, %v1302_v34  ;;  %v1311_v40 = vadd.f32 %v1307_v8, %v1303_v35 }
 0x557   :  { %1312 = vst [vmem:[%s2573_s7] sm:$0xff] %v1308_v36  ;;  %1313 = vst [vmem:[%s2573_s7 + $0x8] sm:$0xff] %v1309_v37  ;;  %v1316_v41 = vpack.c.bf16 %v1309_v37, %v1308_v36  ;;  %v1317_v29 = vpack.c.bf16 %v1311_v40, %v1310_v39 }
 0x558   :  { %1314 = vst [vmem:[%s2573_s7 + $0x10] sm:$0xff] %v1310_v39  ;;  %1315 = vst [vmem:[%s2573_s7 + $0x18] sm:$0xff] %v1311_v40 }
 0x559   :  { %1459 = vmatmul.mubr.bf16.vlgmr.msra.gmra.mxu0 %v1316_v41 }
 0x55a   :  { %1468 = vmatprep.mubr.bf16.mxu0 %v1960_v7 }
 0x561   :  { %1469 = vmatmul.mubr.bf16.gmra.mxu0 %v1317_v29 }
 0x619   :  { %v1460_v48 = vpop.f32.mrf.mxu0 }
 0x61a   :  { %v1461_v49 = vadd.f32 %v1460_v48, %v1339_v24 }
 0x61b   :  { %v1462_v50 = vpop.f32.mrf.mxu0 }
 0x61c   :  { %1479 = vst [vmem:[%s2575_s8] sm:$0xff] %v1461_v49  ;;  %v1463_v51 = vadd.f32 %v1462_v50, %v1343_v32 }
 0x61d   :  { %v1464_v52 = vpop.f32.mrf.mxu0 }
 0x61e   :  { %1480 = vst [vmem:[%s2575_s8 + $0x8] sm:$0xff] %v1463_v51  ;;  %v1465_v59 = vadd.f32 %v1464_v52, %v1339_v24 }
 0x61f   :  { %v1466_v53 = vpop.f32.mrf.mxu0 }
 0x620   :  { %1481 = vst [vmem:[%s2575_s8 + $0x10] sm:$0xff] %v1465_v59  ;;  %v1467_v44 = vadd.f32 %v1466_v53, %v1343_v32 }
 0x621   :  { %v1470_v46 = vpop.f32.mrf.mxu0 }
 0x622   :  { %1482 = vst [vmem:[%s2575_s8 + $0x18] sm:$0xff] %v1467_v44  ;;  %v1471_v54 = vadd.f32 %v1470_v46, %v1339_v24 }
 0x623   :  { %v1472_v42 = vpop.f32.mrf.mxu0 }
 0x624   :  { %1483 = vst [vmem:[%s2575_s8 + $0x20] sm:$0xff] %v1471_v54  ;;  %v1473_v55 = vadd.f32 %v1472_v42, %v1343_v32 }
 0x625   :  { %v1474_v38 = vpop.f32.mrf.mxu0 }
 0x626   :  { %1484 = vst [vmem:[%s2575_s8 + $0x28] sm:$0xff] %v1473_v55  ;;  %v1475_v43 = vadd.f32 %v1474_v38, %v1339_v24 }
 0x627   :  { %v1476_v45 = vpop.f32.mrf.mxu0 }
 0x628   :  { %1485 = vst [vmem:[%s2575_s8 + $0x30] sm:$0xff] %v1475_v43  ;;  %v1477_v56 = vadd.f32 %v1476_v45, %v1343_v32 }
 0x62a   :  { %1486 = vst [vmem:[%s2575_s8 + $0x38] sm:$0xff] %v1477_v56 }

</bundles_post_ra>
